<compile_context>
chip_gen: v7x
topology: tpu7x:2x2x1
jax: 0.10.0
libtpu: 0.0.40
codegen_flags: <defaults>
</compile_context>

<pallas_src>
import math
import functools

import jax
import jax.numpy as jnp
from jax import lax
from jax.experimental import pallas as pl
from jax.experimental.pallas import tpu as pltpu

EPS = 1e-5  # RMSNorm epsilon


# --------------------------------------------------------------------------
# Pallas kernel: one full transformer block for one batch element.
# --------------------------------------------------------------------------
def _transformer_block_kernel(num_heads, head_dim,
                              x_ref, ln1_ref, ln2_ref,
                              wq_ref, wk_ref, wv_ref, wo_ref,
                              w1_ref, w2_ref, w3_ref,
                              cos_ref, sin_ref,
                              o_ref):
    f32 = jnp.float32
    bf16 = jnp.bfloat16

    x = x_ref[0]                                   # (S, D) f32
    S, D = x.shape
    H, hd = num_heads, head_dim
    half = hd // 2

    # ---- RMSNorm 1 (f32 VPU math) -----------------------------------------
    ms = jnp.mean(x * x, axis=-1, keepdims=True)
    xn = x * lax.rsqrt(ms + EPS) * ln1_ref[...]    # (1, D) broadcasts over S
    xn_bf = xn.astype(bf16)                        # cast only at MXU boundary

    # ---- Q / K / V projections: bf16 x bf16 -> f32 accumulation (MXU) ------
    q = jnp.dot(xn_bf, wq_ref[...], preferred_element_type=f32)   # (S, D)
    k = jnp.dot(xn_bf, wk_ref[...], preferred_element_type=f32)   # (S, D)
    v = jnp.dot(xn_bf, wv_ref[...], preferred_element_type=f32)   # (S, D)

    # ---- per-head (H, S, hd) views ------------------------------------------
    # Wq / Wk columns were pre-permuted so each head arrives in rotate-half
    # ("[evens | odds]") layout; V stays in the original interleaved layout.
    q3 = jnp.stack([q[:, h * hd:(h + 1) * hd] for h in range(H)], axis=0)
    k3 = jnp.stack([k[:, h * hd:(h + 1) * hd] for h in range(H)], axis=0)
    v3 = jnp.stack([v[:, h * hd:(h + 1) * hd] for h in range(H)], axis=0)

    cos = cos_ref[...][None]                       # (1, S, hd), [c|c] layout
    sin = sin_ref[...][None]                       # (1, S, hd), [s|s] layout

    def rotate_half(t):                            # [e | o] -> [-o | e]
        return jnp.concatenate([-t[..., half:], t[..., :half]], axis=-1)

    scale = 1.0 / math.sqrt(hd)
    q3 = (q3 * cos + rotate_half(q3) * sin) * scale   # fold softmax scale in
    k3 = k3 * cos + rotate_half(k3) * sin

    # ---- batched causal attention over all heads ----------------------------
    row = lax.broadcasted_iota(jnp.int32, (S, S), 0)
    col = lax.broadcasted_iota(jnp.int32, (S, S), 1)
    causal = (col <= row)[None]                    # (1, S, S)

    sc = jnp.einsum('hqd,hkd->hqk', q3.astype(bf16), k3.astype(bf16),
                    preferred_element_type=f32)    # (H, S, S) f32
    sc = jnp.where(causal, sc, -1e30)              # mask in f32 (bf16-safe N/A)
    sc = sc - jnp.max(sc, axis=-1, keepdims=True)
    p = jnp.exp(sc)
    p = p * pl.reciprocal(jnp.sum(p, axis=-1, keepdims=True), approx=True)
    o3 = jnp.einsum('hqk,hkd->hqd', p.astype(bf16), v3.astype(bf16),
                    preferred_element_type=f32)    # (H, S, hd)

    # head concat + a single (S,D) @ (D,D) output projection (full K=D fill)
    o_cat = jnp.concatenate([o3[h] for h in range(H)], axis=-1).astype(bf16)
    attn = jnp.dot(o_cat, wo_ref[...], preferred_element_type=f32)
    x1 = x + attn                                  # residual 1 (f32)

    # ---- RMSNorm 2 + SwiGLU FFN ---------------------------------------------
    ms2 = jnp.mean(x1 * x1, axis=-1, keepdims=True)
    x1n = x1 * lax.rsqrt(ms2 + EPS) * ln2_ref[...]
    x1n_bf = x1n.astype(bf16)
    h1 = jnp.dot(x1n_bf, w1_ref[...], preferred_element_type=f32)   # (S, F)
    h3 = jnp.dot(x1n_bf, w3_ref[...], preferred_element_type=f32)   # (S, F)
    g = (h1 * jax.nn.sigmoid(h1) * h3).astype(bf16)                 # SiLU in f32
    ffn = jnp.dot(g, w2_ref[...], preferred_element_type=f32)       # (S, D)

    o_ref[0] = (x1 + ffn).astype(o_ref.dtype)      # residual 2


# --------------------------------------------------------------------------
# Wrapper: builds RoPE tables, pre-permutes Wq/Wk, launches pallas_call.
# --------------------------------------------------------------------------
def transformer_block_pallas(x, params, num_heads, theta=10000.0):
    ln1_w, ln2_w, wq, wk, wv, wo, w1, w2, w3 = params
    B, S, D = x.shape
    assert D % num_heads == 0
    head_dim = D // num_heads
    assert head_dim % 2 == 0
    F = w1.shape[0]
    bf16 = jnp.bfloat16

    # RoPE tables in rotate-half layout, (S, head_dim): [cos|cos], [sin|sin].
    pos = jnp.arange(S, dtype=jnp.float32)          # default token_positions
    inv_freq = 1.0 / (theta ** (jnp.arange(0, head_dim, 2, dtype=jnp.float32)
                                / head_dim))
    ang = pos[:, None] * inv_freq[None, :]          # (S, hd/2)
    cos_hl = jnp.concatenate([jnp.cos(ang), jnp.cos(ang)], axis=-1)  # (S, hd)
    sin_hl = jnp.concatenate([jnp.sin(ang), jnp.sin(ang)], axis=-1)  # (S, hd)

    # Permute Wq/Wk output features so each head emerges as [evens | odds];
    # per-head dot products (scores) are invariant under this permutation.
    idx_head = jnp.concatenate([jnp.arange(0, head_dim, 2),
                                jnp.arange(1, head_dim, 2)])
    perm = (jnp.arange(num_heads)[:, None] * head_dim
            + idx_head[None, :]).reshape(-1)        # (D,)

    # Weights pre-transposed to (in, out) and cast to bf16 (half the DMA/VMEM).
    wq_t = wq.T[:, perm].astype(bf16)
    wk_t = wk.T[:, perm].astype(bf16)
    wv_t = wv.T.astype(bf16)
    wo_t = wo.T.astype(bf16)
    w1_t = w1.T.astype(bf16)
    w2_t = w2.T.astype(bf16)
    w3_t = w3.T.astype(bf16)

    kernel = functools.partial(_transformer_block_kernel, num_heads, head_dim)
    full = lambda shape: pl.BlockSpec(shape, lambda b: (0,) * len(shape))

    grid_spec = pltpu.PrefetchScalarGridSpec(
        num_scalar_prefetch=0,
        grid=(B,),
        in_specs=[
            pl.BlockSpec((1, S, D), lambda b: (b, 0, 0)),   # x
            full((1, D)), full((1, D)),                     # ln1_w, ln2_w
            full((D, D)), full((D, D)), full((D, D)), full((D, D)),  # Wq/Wk/Wv/Wo^T
            full((D, F)), full((F, D)), full((D, F)),       # W1^T, W2^T, W3^T
            full((S, head_dim)), full((S, head_dim)),       # cos, sin tables
        ],
        out_specs=pl.BlockSpec((1, S, D), lambda b: (b, 0, 0)),
    )

    return pl.pallas_call(
        kernel,
        out_shape=jax.ShapeDtypeStruct((B, S, D), jnp.float32),
        grid_spec=grid_spec,
        compiler_params=pltpu.CompilerParams(
            dimension_semantics=("parallel",),
            vmem_limit_bytes=64 * 1024 * 1024),
    )(x, ln1_w[None, :], ln2_w[None, :],
      wq_t, wk_t, wv_t, wo_t, w1_t, w2_t, w3_t,
      cos_hl, sin_hl)


# --------------------------------------------------------------------------
# Pure-JAX reference mirroring the PyTorch forward pass (for validation).
# --------------------------------------------------------------------------
def transformer_block_ref(x, params, num_heads, theta=10000.0):
    ln1_w, ln2_w, wq, wk, wv, wo, w1, w2, w3 = params
    B, S, D = x.shape
    hd = D // num_heads

    def rmsnorm(t, w):
        return t * lax.rsqrt(jnp.mean(t * t, axis=-1, keepdims=True) + EPS) * w

    xn = rmsnorm(x, ln1_w)
    q, k, v = xn @ wq.T, xn @ wk.T, xn @ wv.T

    def split(t):
        return t.reshape(B, S, num_heads, hd).transpose(0, 2, 1, 3)
    q, k, v = split(q), split(k), split(v)

    pos = jnp.arange(S, dtype=jnp.float32)
    inv_freq = 1.0 / (theta ** (jnp.arange(0, hd, 2, dtype=jnp.float32) / hd))
    ang = pos[:, None] * inv_freq[None, :]
    c, s = jnp.cos(ang), jnp.sin(ang)

    def rope(t):
        t1, t2 = t[..., 0::2], t[..., 1::2]
        r1 = t1 * c - t2 * s
        r2 = t1 * s + t2 * c
        return jnp.stack([r1, r2], axis=-1).reshape(t.shape)

    q, k = rope(q), rope(k)
    scores = jnp.einsum('bhqd,bhkd->bhqk', q, k) / math.sqrt(hd)
    mask = jnp.tril(jnp.ones((S, S), dtype=bool))
    scores = jnp.where(mask, scores, -jnp.inf)
    p = jax.nn.softmax(scores, axis=-1)
    o = jnp.einsum('bhqk,bhkd->bhqd', p, v)
    o = o.transpose(0, 2, 1, 3).reshape(B, S, D)
    x1 = x + o @ wo.T

    x1n = rmsnorm(x1, ln2_w)
    h1, h3 = x1n @ w1.T, x1n @ w3.T
    return x1 + (h1 * jax.nn.sigmoid(h1) * h3) @ w2.T


if __name__ == "__main__":
    B, S, D, H, F = 2, 16, 64, 4, 128   # batch, seq, d_model, heads, d_ff

    key = jax.random.PRNGKey(0)
    ks = jax.random.split(key, 10)
    x = jax.random.normal(ks[0], (B, S, D), jnp.float32)

    ln1_w = 1.0 + 0.1 * jax.random.normal(ks[1], (D,), jnp.float32)
    ln2_w = 1.0 + 0.1 * jax.random.normal(ks[2], (D,), jnp.float32)

    def lin(k, out_f, in_f):   # PyTorch-style (out_features, in_features)
        std = math.sqrt(2.0 / (in_f + out_f))
        return std * jax.random.normal(k, (out_f, in_f), jnp.float32)

    wq, wk, wv, wo = (lin(ks[3], D, D), lin(ks[4], D, D),
                      lin(ks[5], D, D), lin(ks[6], D, D))
    w1, w2, w3 = lin(ks[7], F, D), lin(ks[8], D, F), lin(ks[9], F, D)
    params = (ln1_w, ln2_w, wq, wk, wv, wo, w1, w2, w3)

    out = transformer_block_pallas(x, params, num_heads=H)
    out = jax.block_until_ready(out)

    # Full-precision reference; the kernel uses bf16 MXU operands with f32
    # accumulation, so allow bf16-level tolerance.
    with jax.default_matmul_precision("highest"):
        ref = transformer_block_ref(x, params, num_heads=H)
        ref = jax.block_until_ready(ref)

    assert out.shape == (B, S, D)
    if not bool(jnp.allclose(out, ref, atol=4e-2, rtol=4e-2)):
        raise AssertionError(
            f"mismatch vs reference, max abs err = {jnp.max(jnp.abs(out - ref))}")
    print("KERNEL_OK")
</pallas_src>

<mosaic_0001>
module attributes {stable_mosaic.version = 11 : i64} {
  func.func @_transformer_block_kernel(%arg0: i32, %arg1: memref<1x16x64xf32, #tpu.memory_space<vmem>>, %arg2: memref<1x64xf32, #tpu.memory_space<vmem>>, %arg3: memref<1x64xf32, #tpu.memory_space<vmem>>, %arg4: memref<64x64xbf16, #tpu.memory_space<vmem>>, %arg5: memref<64x64xbf16, #tpu.memory_space<vmem>>, %arg6: memref<64x64xbf16, #tpu.memory_space<vmem>>, %arg7: memref<64x64xbf16, #tpu.memory_space<vmem>>, %arg8: memref<64x128xbf16, #tpu.memory_space<vmem>>, %arg9: memref<128x64xbf16, #tpu.memory_space<vmem>>, %arg10: memref<64x128xbf16, #tpu.memory_space<vmem>>, %arg11: memref<16x16xf32, #tpu.memory_space<vmem>>, %arg12: memref<16x16xf32, #tpu.memory_space<vmem>>, %arg13: memref<1x16x64xf32, #tpu.memory_space<vmem>>) attributes {dimension_semantics = [#tpu.dimension_semantics<parallel>], iteration_bounds = array<i64: 2>, scalar_prefetch = 0 : i64, scratch_operands = 0 : i64, tpu.core_type = #tpu.core_type<tc>, window_params = [{transform_indices = @transform_0, window_bounds = array<i64: 1, 16, 64>}, {pipeline_mode = #tpu.pipeline_mode<synchronous>, transform_indices = @transform_1, window_bounds = array<i64: 1, 64>}, {pipeline_mode = #tpu.pipeline_mode<synchronous>, transform_indices = @transform_2, window_bounds = array<i64: 1, 64>}, {pipeline_mode = #tpu.pipeline_mode<synchronous>, transform_indices = @transform_3, window_bounds = array<i64: 64, 64>}, {pipeline_mode = #tpu.pipeline_mode<synchronous>, transform_indices = @transform_4, window_bounds = array<i64: 64, 64>}, {pipeline_mode = #tpu.pipeline_mode<synchronous>, transform_indices = @transform_5, window_bounds = array<i64: 64, 64>}, {pipeline_mode = #tpu.pipeline_mode<synchronous>, transform_indices = @transform_6, window_bounds = array<i64: 64, 64>}, {pipeline_mode = #tpu.pipeline_mode<synchronous>, transform_indices = @transform_7, window_bounds = array<i64: 64, 128>}, {pipeline_mode = #tpu.pipeline_mode<synchronous>, transform_indices = @transform_8, window_bounds = array<i64: 128, 64>}, {pipeline_mode = #tpu.pipeline_mode<synchronous>, transform_indices = @transform_9, window_bounds = array<i64: 64, 128>}, {pipeline_mode = #tpu.pipeline_mode<synchronous>, transform_indices = @transform_10, window_bounds = array<i64: 16, 16>}, {pipeline_mode = #tpu.pipeline_mode<synchronous>, transform_indices = @transform_11, window_bounds = array<i64: 16, 16>}, {transform_indices = @transform_12, window_bounds = array<i64: 1, 16, 64>}]} {
    %c0 = arith.constant 0 : index
    %c0_0 = arith.constant 0 : index
    %c0_1 = arith.constant 0 : index
    %0 = vector.load %arg1[%c0, %c0_0, %c0_1] : memref<1x16x64xf32, #tpu.memory_space<vmem>>, vector<1x16x64xf32>
    %1 = vector.shape_cast %0 : vector<1x16x64xf32> to vector<16x64xf32>
    %2 = arith.mulf %1, %1 : vector<16x64xf32>
    %cst = arith.constant dense<0.000000e+00> : vector<16xf32>
    %3 = vector.multi_reduction <add>, %2, %cst [1] : vector<16x64xf32> to vector<16xf32>
    %4 = vector.shape_cast %3 : vector<16xf32> to vector<16x1xf32>
    %cst_2 = arith.constant 6.400000e+01 : f32
    %5 = vector.broadcast %cst_2 : f32 to vector<16x1xf32>
    %6 = arith.divf %4, %5 : vector<16x1xf32>
    %cst_3 = arith.constant 9.99999974E-6 : f32
    %7 = vector.broadcast %cst_3 : f32 to vector<16x1xf32>
    %8 = arith.addf %6, %7 : vector<16x1xf32>
    %9 = math.rsqrt %8 : vector<16x1xf32>
    %10 = vector.broadcast %9 : vector<16x1xf32> to vector<16x64xf32>
    %11 = arith.mulf %1, %10 : vector<16x64xf32>
    %c0_4 = arith.constant 0 : index
    %c0_5 = arith.constant 0 : index
    %12 = vector.load %arg2[%c0_4, %c0_5] : memref<1x64xf32, #tpu.memory_space<vmem>>, vector<1x64xf32>
    %13 = vector.broadcast %12 : vector<1x64xf32> to vector<16x64xf32>
    %14 = arith.mulf %11, %13 : vector<16x64xf32>
    %15 = arith.truncf %14 : vector<16x64xf32> to vector<16x64xbf16>
    %c0_6 = arith.constant 0 : index
    %c0_7 = arith.constant 0 : index
    %16 = vector.load %arg4[%c0_6, %c0_7] : memref<64x64xbf16, #tpu.memory_space<vmem>>, vector<64x64xbf16>
    %cst_8 = arith.constant dense<0.000000e+00> : vector<16x64xf32>
    %17 = tpu.matmul %15, %16, %cst_8 {dimension_numbers = #tpu.dot_dimension_numbers<[1], [0], [0], [1], [0, 0, 1, 1], [], []>} : vector<16x64xbf16>, vector<64x64xbf16>, vector<16x64xf32> -> vector<16x64xf32>
    %c0_9 = arith.constant 0 : index
    %c0_10 = arith.constant 0 : index
    %18 = vector.load %arg5[%c0_9, %c0_10] : memref<64x64xbf16, #tpu.memory_space<vmem>>, vector<64x64xbf16>
    %cst_11 = arith.constant dense<0.000000e+00> : vector<16x64xf32>
    %19 = tpu.matmul %15, %18, %cst_11 {dimension_numbers = #tpu.dot_dimension_numbers<[1], [0], [0], [1], [0, 0, 1, 1], [], []>} : vector<16x64xbf16>, vector<64x64xbf16>, vector<16x64xf32> -> vector<16x64xf32>
    %c0_12 = arith.constant 0 : index
    %c0_13 = arith.constant 0 : index
    %20 = vector.load %arg6[%c0_12, %c0_13] : memref<64x64xbf16, #tpu.memory_space<vmem>>, vector<64x64xbf16>
    %cst_14 = arith.constant dense<0.000000e+00> : vector<16x64xf32>
    %21 = tpu.matmul %15, %20, %cst_14 {dimension_numbers = #tpu.dot_dimension_numbers<[1], [0], [0], [1], [0, 0, 1, 1], [], []>} : vector<16x64xbf16>, vector<64x64xbf16>, vector<16x64xf32> -> vector<16x64xf32>
    %22 = vector.extract_strided_slice %17 {offsets = [0, 0], sizes = [16, 16], strides = [1, 1]} : vector<16x64xf32> to vector<16x16xf32>
    %23 = vector.extract_strided_slice %17 {offsets = [0, 16], sizes = [16, 16], strides = [1, 1]} : vector<16x64xf32> to vector<16x16xf32>
    %24 = vector.extract_strided_slice %17 {offsets = [0, 32], sizes = [16, 16], strides = [1, 1]} : vector<16x64xf32> to vector<16x16xf32>
    %25 = vector.extract_strided_slice %17 {offsets = [0, 48], sizes = [16, 16], strides = [1, 1]} : vector<16x64xf32> to vector<16x16xf32>
    %26 = vector.shape_cast %22 : vector<16x16xf32> to vector<1x16x16xf32>
    %27 = vector.shape_cast %23 : vector<16x16xf32> to vector<1x16x16xf32>
    %28 = vector.shape_cast %24 : vector<16x16xf32> to vector<1x16x16xf32>
    %29 = vector.shape_cast %25 : vector<16x16xf32> to vector<1x16x16xf32>
    %30 = tpu.concatenate %26, %27, %28, %29 in 0 : vector<1x16x16xf32>, vector<1x16x16xf32>, vector<1x16x16xf32>, vector<1x16x16xf32> -> vector<4x16x16xf32>
    %31 = vector.extract_strided_slice %19 {offsets = [0, 0], sizes = [16, 16], strides = [1, 1]} : vector<16x64xf32> to vector<16x16xf32>
    %32 = vector.extract_strided_slice %19 {offsets = [0, 16], sizes = [16, 16], strides = [1, 1]} : vector<16x64xf32> to vector<16x16xf32>
    %33 = vector.extract_strided_slice %19 {offsets = [0, 32], sizes = [16, 16], strides = [1, 1]} : vector<16x64xf32> to vector<16x16xf32>
    %34 = vector.extract_strided_slice %19 {offsets = [0, 48], sizes = [16, 16], strides = [1, 1]} : vector<16x64xf32> to vector<16x16xf32>
    %35 = vector.shape_cast %31 : vector<16x16xf32> to vector<1x16x16xf32>
    %36 = vector.shape_cast %32 : vector<16x16xf32> to vector<1x16x16xf32>
    %37 = vector.shape_cast %33 : vector<16x16xf32> to vector<1x16x16xf32>
    %38 = vector.shape_cast %34 : vector<16x16xf32> to vector<1x16x16xf32>
    %39 = tpu.concatenate %35, %36, %37, %38 in 0 : vector<1x16x16xf32>, vector<1x16x16xf32>, vector<1x16x16xf32>, vector<1x16x16xf32> -> vector<4x16x16xf32>
    %40 = vector.extract_strided_slice %21 {offsets = [0, 0], sizes = [16, 16], strides = [1, 1]} : vector<16x64xf32> to vector<16x16xf32>
    %41 = vector.extract_strided_slice %21 {offsets = [0, 16], sizes = [16, 16], strides = [1, 1]} : vector<16x64xf32> to vector<16x16xf32>
    %42 = vector.extract_strided_slice %21 {offsets = [0, 32], sizes = [16, 16], strides = [1, 1]} : vector<16x64xf32> to vector<16x16xf32>
    %43 = vector.extract_strided_slice %21 {offsets = [0, 48], sizes = [16, 16], strides = [1, 1]} : vector<16x64xf32> to vector<16x16xf32>
    %44 = vector.shape_cast %40 : vector<16x16xf32> to vector<1x16x16xf32>
    %45 = vector.shape_cast %41 : vector<16x16xf32> to vector<1x16x16xf32>
    %46 = vector.shape_cast %42 : vector<16x16xf32> to vector<1x16x16xf32>
    %47 = vector.shape_cast %43 : vector<16x16xf32> to vector<1x16x16xf32>
    %48 = tpu.concatenate %44, %45, %46, %47 in 0 : vector<1x16x16xf32>, vector<1x16x16xf32>, vector<1x16x16xf32>, vector<1x16x16xf32> -> vector<4x16x16xf32>
    %c0_15 = arith.constant 0 : index
    %c0_16 = arith.constant 0 : index
    %49 = vector.load %arg11[%c0_15, %c0_16] : memref<16x16xf32, #tpu.memory_space<vmem>>, vector<16x16xf32>
    %50 = vector.shape_cast %49 : vector<16x16xf32> to vector<1x16x16xf32>
    %c0_17 = arith.constant 0 : index
    %c0_18 = arith.constant 0 : index
    %51 = vector.load %arg12[%c0_17, %c0_18] : memref<16x16xf32, #tpu.memory_space<vmem>>, vector<16x16xf32>
    %52 = vector.shape_cast %51 : vector<16x16xf32> to vector<1x16x16xf32>
    %53 = vector.broadcast %50 : vector<1x16x16xf32> to vector<4x16x16xf32>
    %54 = arith.mulf %30, %53 : vector<4x16x16xf32>
    %55 = vector.extract_strided_slice %30 {offsets = [0, 0, 8], sizes = [4, 16, 8], strides = [1, 1, 1]} : vector<4x16x16xf32> to vector<4x16x8xf32>
    %cst_19 = arith.constant 0.000000e+00 : f32
    %56 = vector.broadcast %cst_19 : f32 to vector<4x16x8xf32>
    %57 = arith.subf %56, %55 : vector<4x16x8xf32>
    %58 = vector.extract_strided_slice %30 {offsets = [0, 0, 0], sizes = [4, 16, 8], strides = [1, 1, 1]} : vector<4x16x16xf32> to vector<4x16x8xf32>
    %59 = tpu.concatenate %57, %58 in 2 : vector<4x16x8xf32>, vector<4x16x8xf32> -> vector<4x16x16xf32>
    %60 = vector.broadcast %52 : vector<1x16x16xf32> to vector<4x16x16xf32>
    %61 = arith.mulf %59, %60 : vector<4x16x16xf32>
    %62 = arith.addf %54, %61 : vector<4x16x16xf32>
    %cst_20 = arith.constant 2.500000e-01 : f32
    %63 = vector.broadcast %cst_20 : f32 to vector<4x16x16xf32>
    %64 = arith.mulf %62, %63 : vector<4x16x16xf32>
    %65 = vector.broadcast %50 : vector<1x16x16xf32> to vector<4x16x16xf32>
    %66 = arith.mulf %39, %65 : vector<4x16x16xf32>
    %67 = vector.extract_strided_slice %39 {offsets = [0, 0, 8], sizes = [4, 16, 8], strides = [1, 1, 1]} : vector<4x16x16xf32> to vector<4x16x8xf32>
    %cst_21 = arith.constant 0.000000e+00 : f32
    %68 = vector.broadcast %cst_21 : f32 to vector<4x16x8xf32>
    %69 = arith.subf %68, %67 : vector<4x16x8xf32>
    %70 = vector.extract_strided_slice %39 {offsets = [0, 0, 0], sizes = [4, 16, 8], strides = [1, 1, 1]} : vector<4x16x16xf32> to vector<4x16x8xf32>
    %71 = tpu.concatenate %69, %70 in 2 : vector<4x16x8xf32>, vector<4x16x8xf32> -> vector<4x16x16xf32>
    %72 = vector.broadcast %52 : vector<1x16x16xf32> to vector<4x16x16xf32>
    %73 = arith.mulf %71, %72 : vector<4x16x16xf32>
    %74 = arith.addf %66, %73 : vector<4x16x16xf32>
    %75 = tpu.iota {dimensions = array<i32: 0>} : vector<16x16xi32>
    %76 = tpu.iota {dimensions = array<i32: 1>} : vector<16x16xi32>
    %77 = arith.cmpi sle, %76, %75 : vector<16x16xi32>
    %78 = vector.shape_cast %77 : vector<16x16xi1> to vector<1x16x16xi1>
    %79 = arith.truncf %64 : vector<4x16x16xf32> to vector<4x16x16xbf16>
    %80 = arith.truncf %74 : vector<4x16x16xf32> to vector<4x16x16xbf16>
    "tpu.trace_start"() <{level = 10 : i32, message = "hqd,hkd->hqk"}> : () -> ()
    %cst_22 = arith.constant dense<0.000000e+00> : vector<4x16x16xf32>
    %81 = tpu.matmul %79, %80, %cst_22 {dimension_numbers = #tpu.dot_dimension_numbers<[2], [2], [1], [1], [0, 0, 0, 1, 1, 1], [0], [0]>} : vector<4x16x16xbf16>, vector<4x16x16xbf16>, vector<4x16x16xf32> -> vector<4x16x16xf32>
    %cst_23 = arith.constant -1.000000e+30 : f32
    "tpu.trace_stop"() : () -> ()
    %82 = vector.shape_cast %78 : vector<1x16x16xi1> to vector<1x16x16xi1>
    %83 = vector.broadcast %82 : vector<1x16x16xi1> to vector<4x16x16xi1>
    %84 = vector.broadcast %cst_23 : f32 to vector<4x16x16xf32>
    %85 = arith.select %83, %81, %84 : vector<4x16x16xi1>, vector<4x16x16xf32>
    %cst_24 = arith.constant dense<0xFF800000> : vector<4x16xf32>
    %86 = vector.multi_reduction <maximumf>, %85, %cst_24 [2] : vector<4x16x16xf32> to vector<4x16xf32>
    %87 = vector.shape_cast %86 : vector<4x16xf32> to vector<4x16x1xf32>
    %88 = vector.broadcast %87 : vector<4x16x1xf32> to vector<4x16x16xf32>
    %89 = arith.subf %85, %88 : vector<4x16x16xf32>
    %90 = math.exp %89 : vector<4x16x16xf32>
    %cst_25 = arith.constant dense<0.000000e+00> : vector<4x16xf32>
    %91 = vector.multi_reduction <add>, %90, %cst_25 [2] : vector<4x16x16xf32> to vector<4x16xf32>
    %92 = vector.shape_cast %91 : vector<4x16xf32> to vector<4x16x1xf32>
    %93 = tpu.reciprocal %92 {approx = true} : vector<4x16x1xf32> -> vector<4x16x1xf32>
    %94 = vector.broadcast %93 : vector<4x16x1xf32> to vector<4x16x16xf32>
    %95 = arith.mulf %90, %94 : vector<4x16x16xf32>
    %96 = arith.truncf %95 : vector<4x16x16xf32> to vector<4x16x16xbf16>
    %97 = arith.truncf %48 : vector<4x16x16xf32> to vector<4x16x16xbf16>
    "tpu.trace_start"() <{level = 10 : i32, message = "hqk,hkd->hqd"}> : () -> ()
    %cst_26 = arith.constant dense<0.000000e+00> : vector<4x16x16xf32>
    %98 = tpu.matmul %96, %97, %cst_26 {dimension_numbers = #tpu.dot_dimension_numbers<[2], [1], [1], [2], [0, 0, 0, 1, 1, 2], [0], [0]>} : vector<4x16x16xbf16>, vector<4x16x16xbf16>, vector<4x16x16xf32> -> vector<4x16x16xf32>
    "tpu.trace_stop"() : () -> ()
    %99 = vector.extract_strided_slice %98 {offsets = [0, 0, 0], sizes = [1, 16, 16], strides = [1, 1, 1]} : vector<4x16x16xf32> to vector<1x16x16xf32>
    %100 = vector.shape_cast %99 : vector<1x16x16xf32> to vector<16x16xf32>
    %101 = vector.extract_strided_slice %98 {offsets = [1, 0, 0], sizes = [1, 16, 16], strides = [1, 1, 1]} : vector<4x16x16xf32> to vector<1x16x16xf32>
    %102 = vector.shape_cast %101 : vector<1x16x16xf32> to vector<16x16xf32>
    %103 = vector.extract_strided_slice %98 {offsets = [2, 0, 0], sizes = [1, 16, 16], strides = [1, 1, 1]} : vector<4x16x16xf32> to vector<1x16x16xf32>
    %104 = vector.shape_cast %103 : vector<1x16x16xf32> to vector<16x16xf32>
    %105 = vector.extract_strided_slice %98 {offsets = [3, 0, 0], sizes = [1, 16, 16], strides = [1, 1, 1]} : vector<4x16x16xf32> to vector<1x16x16xf32>
    %106 = vector.shape_cast %105 : vector<1x16x16xf32> to vector<16x16xf32>
    %107 = tpu.concatenate %100, %102, %104, %106 in 1 : vector<16x16xf32>, vector<16x16xf32>, vector<16x16xf32>, vector<16x16xf32> -> vector<16x64xf32>
    %108 = arith.truncf %107 : vector<16x64xf32> to vector<16x64xbf16>
    %c0_27 = arith.constant 0 : index
    %c0_28 = arith.constant 0 : index
    %109 = vector.load %arg7[%c0_27, %c0_28] : memref<64x64xbf16, #tpu.memory_space<vmem>>, vector<64x64xbf16>
    %cst_29 = arith.constant dense<0.000000e+00> : vector<16x64xf32>
    %110 = tpu.matmul %108, %109, %cst_29 {dimension_numbers = #tpu.dot_dimension_numbers<[1], [0], [0], [1], [0, 0, 1, 1], [], []>} : vector<16x64xbf16>, vector<64x64xbf16>, vector<16x64xf32> -> vector<16x64xf32>
    %111 = arith.addf %1, %110 : vector<16x64xf32>
    %112 = arith.mulf %111, %111 : vector<16x64xf32>
    %cst_30 = arith.constant dense<0.000000e+00> : vector<16xf32>
    %113 = vector.multi_reduction <add>, %112, %cst_30 [1] : vector<16x64xf32> to vector<16xf32>
    %114 = vector.shape_cast %113 : vector<16xf32> to vector<16x1xf32>
    %cst_31 = arith.constant 6.400000e+01 : f32
    %115 = vector.broadcast %cst_31 : f32 to vector<16x1xf32>
    %116 = arith.divf %114, %115 : vector<16x1xf32>
    %cst_32 = arith.constant 9.99999974E-6 : f32
    %117 = vector.broadcast %cst_32 : f32 to vector<16x1xf32>
    %118 = arith.addf %116, %117 : vector<16x1xf32>
    %119 = math.rsqrt %118 : vector<16x1xf32>
    %120 = vector.broadcast %119 : vector<16x1xf32> to vector<16x64xf32>
    %121 = arith.mulf %111, %120 : vector<16x64xf32>
    %c0_33 = arith.constant 0 : index
    %c0_34 = arith.constant 0 : index
    %122 = vector.load %arg3[%c0_33, %c0_34] : memref<1x64xf32, #tpu.memory_space<vmem>>, vector<1x64xf32>
    %123 = vector.broadcast %122 : vector<1x64xf32> to vector<16x64xf32>
    %124 = arith.mulf %121, %123 : vector<16x64xf32>
    %125 = arith.truncf %124 : vector<16x64xf32> to vector<16x64xbf16>
    %c0_35 = arith.constant 0 : index
    %c0_36 = arith.constant 0 : index
    %126 = vector.load %arg8[%c0_35, %c0_36] : memref<64x128xbf16, #tpu.memory_space<vmem>>, vector<64x128xbf16>
    %cst_37 = arith.constant dense<0.000000e+00> : vector<16x128xf32>
    %127 = tpu.matmul %125, %126, %cst_37 {dimension_numbers = #tpu.dot_dimension_numbers<[1], [0], [0], [1], [0, 0, 1, 1], [], []>} : vector<16x64xbf16>, vector<64x128xbf16>, vector<16x128xf32> -> vector<16x128xf32>
    %c0_38 = arith.constant 0 : index
    %c0_39 = arith.constant 0 : index
    %128 = vector.load %arg10[%c0_38, %c0_39] : memref<64x128xbf16, #tpu.memory_space<vmem>>, vector<64x128xbf16>
    %cst_40 = arith.constant dense<0.000000e+00> : vector<16x128xf32>
    %129 = tpu.matmul %125, %128, %cst_40 {dimension_numbers = #tpu.dot_dimension_numbers<[1], [0], [0], [1], [0, 0, 1, 1], [], []>} : vector<16x64xbf16>, vector<64x128xbf16>, vector<16x128xf32> -> vector<16x128xf32>
    %130 = arith.negf %127 : vector<16x128xf32>
    %131 = math.exp %130 : vector<16x128xf32>
    %cst_41 = arith.constant 1.000000e+00 : f32
    %132 = vector.broadcast %cst_41 : f32 to vector<16x128xf32>
    %133 = arith.addf %132, %131 : vector<16x128xf32>
    %134 = arith.divf %132, %133 : vector<16x128xf32>
    %135 = arith.mulf %127, %134 : vector<16x128xf32>
    %136 = arith.mulf %135, %129 : vector<16x128xf32>
    %137 = arith.truncf %136 : vector<16x128xf32> to vector<16x128xbf16>
    %c0_42 = arith.constant 0 : index
    %c0_43 = arith.constant 0 : index
    %138 = vector.load %arg9[%c0_42, %c0_43] : memref<128x64xbf16, #tpu.memory_space<vmem>>, vector<128x64xbf16>
    %cst_44 = arith.constant dense<0.000000e+00> : vector<16x64xf32>
    %139 = tpu.matmul %137, %138, %cst_44 {dimension_numbers = #tpu.dot_dimension_numbers<[1], [0], [0], [1], [0, 0, 1, 1], [], []>} : vector<16x128xbf16>, vector<128x64xbf16>, vector<16x64xf32> -> vector<16x64xf32>
    %140 = arith.addf %111, %139 : vector<16x64xf32>
    %c0_45 = arith.constant 0 : index
    %c0_46 = arith.constant 0 : index
    %c0_47 = arith.constant 0 : index
    %141 = vector.load %arg13[%c0_45, %c0_46, %c0_47] : memref<1x16x64xf32, #tpu.memory_space<vmem>>, vector<1x16x64xf32>
    %142 = vector.shape_cast %141 : vector<1x16x64xf32> to vector<16x64xf32>
    %143 = vector.shape_cast %140 : vector<16x64xf32> to vector<1x16x64xf32>
    tpu.vector_store %arg13[%c0_45, %c0_46, %c0_47], %143 {strides = array<i32>} : memref<1x16x64xf32, #tpu.memory_space<vmem>>, vector<1x16x64xf32>,
    return
  }
  func.func @transform_0(%arg0: i32) -> (i32, i32, i32) {
    %c0_i32 = arith.constant 0 : i32
    %c0_i32_0 = arith.constant 0 : i32
    %c0_i32_1 = arith.constant 0 : i32
    return %arg0, %c0_i32, %c0_i32_0 : i32, i32, i32
  }
  func.func @transform_1(%arg0: i32) -> (i32, i32) {
    %c0_i32 = arith.constant 0 : i32
    %c0_i32_0 = arith.constant 0 : i32
    %c0_i32_1 = arith.constant 0 : i32
    return %c0_i32, %c0_i32_0 : i32, i32
  }
  func.func @transform_2(%arg0: i32) -> (i32, i32) {
    %c0_i32 = arith.constant 0 : i32
    %c0_i32_0 = arith.constant 0 : i32
    %c0_i32_1 = arith.constant 0 : i32
    return %c0_i32, %c0_i32_0 : i32, i32
  }
  func.func @transform_3(%arg0: i32) -> (i32, i32) {
    %c0_i32 = arith.constant 0 : i32
    %c0_i32_0 = arith.constant 0 : i32
    %c0_i32_1 = arith.constant 0 : i32
    return %c0_i32, %c0_i32_0 : i32, i32
  }
  func.func @transform_4(%arg0: i32) -> (i32, i32) {
    %c0_i32 = arith.constant 0 : i32
    %c0_i32_0 = arith.constant 0 : i32
    %c0_i32_1 = arith.constant 0 : i32
    return %c0_i32, %c0_i32_0 : i32, i32
  }
  func.func @transform_5(%arg0: i32) -> (i32, i32) {
    %c0_i32 = arith.constant 0 : i32
    %c0_i32_0 = arith.constant 0 : i32
    %c0_i32_1 = arith.constant 0 : i32
    return %c0_i32, %c0_i32_0 : i32, i32
  }
  func.func @transform_6(%arg0: i32) -> (i32, i32) {
    %c0_i32 = arith.constant 0 : i32
    %c0_i32_0 = arith.constant 0 : i32
    %c0_i32_1 = arith.constant 0 : i32
    return %c0_i32, %c0_i32_0 : i32, i32
  }
  func.func @transform_7(%arg0: i32) -> (i32, i32) {
    %c0_i32 = arith.constant 0 : i32
    %c0_i32_0 = arith.constant 0 : i32
    %c0_i32_1 = arith.constant 0 : i32
    return %c0_i32, %c0_i32_0 : i32, i32
  }
  func.func @transform_8(%arg0: i32) -> (i32, i32) {
    %c0_i32 = arith.constant 0 : i32
    %c0_i32_0 = arith.constant 0 : i32
    %c0_i32_1 = arith.constant 0 : i32
    return %c0_i32, %c0_i32_0 : i32, i32
  }
  func.func @transform_9(%arg0: i32) -> (i32, i32) {
    %c0_i32 = arith.constant 0 : i32
    %c0_i32_0 = arith.constant 0 : i32
    %c0_i32_1 = arith.constant 0 : i32
    return %c0_i32, %c0_i32_0 : i32, i32
  }
  func.func @transform_10(%arg0: i32) -> (i32, i32) {
    %c0_i32 = arith.constant 0 : i32
    %c0_i32_0 = arith.constant 0 : i32
    %c0_i32_1 = arith.constant 0 : i32
    return %c0_i32, %c0_i32_0 : i32, i32
  }
  func.func @transform_11(%arg0: i32) -> (i32, i32) {
    %c0_i32 = arith.constant 0 : i32
    %c0_i32_0 = arith.constant 0 : i32
    %c0_i32_1 = arith.constant 0 : i32
    return %c0_i32, %c0_i32_0 : i32, i32
  }
  func.func @transform_12(%arg0: i32) -> (i32, i32, i32) {
    %c0_i32 = arith.constant 0 : i32
    %c0_i32_0 = arith.constant 0 : i32
    %c0_i32_1 = arith.constant 0 : i32
    return %arg0, %c0_i32, %c0_i32_0 : i32, i32, i32
  }
}

</mosaic_0001>

<bundles_post_ra>
// kernel: tpu_custom_call.1
= control target key start
LH: loop header
LB: loop body
LE: loop exit
PB: predicated region body
PF: predicated region fallthrough
CT: control target
= control target key end

     0   :  { %s4106_s0 = inlined_call_operand.hbm [shape: f32[2,16,64], index: 0, kind: input, shape index: {}]   ;;  %s4107_s1 = inlined_call_operand.hbm [shape: f32[1,64], index: 1, kind: input, shape index: {}]   ;;  %s4108_s2 = inlined_call_operand.hbm [shape: f32[1,64], index: 2, kind: input, shape index: {}]   ;;  %s4109_s3 = inlined_call_operand.hbm [shape: bf16[64,64], index: 3, kind: input, shape index: {}]   ;;  %s4110_s4 = inlined_call_operand.hbm [shape: bf16[64,64], index: 4, kind: input, shape index: {}]   ;;  %s4111_s5 = inlined_call_operand.hbm [shape: bf16[64,64], index: 5, kind: input, shape index: {}]   ;;  %s4112_s6 = inlined_call_operand.hbm [shape: bf16[64,64], index: 6, kind: input, shape index: {}]   ;;  %s4113_s7 = inlined_call_operand.hbm [shape: bf16[64,128], index: 7, kind: input, shape index: {}]   ;;  %s4114_s8 = inlined_call_operand.hbm [shape: bf16[128,64], index: 8, kind: input, shape index: {}]   ;;  %s4115_s9 = inlined_call_operand.hbm [shape: bf16[64,128], index: 9, kind: input, shape index: {}]   ;;  %s4116_s10 = inlined_call_operand.hbm [shape: f32[16,16], index: 10, kind: input, shape index: {}]   ;;  %s4117_s11 = inlined_call_operand.hbm [shape: f32[16,16], index: 11, kind: input, shape index: {}]   ;;  %s4118_s12 = inlined_call_operand.hbm [shape: f32[2,16,64], index: 12, kind: output, shape index: {}]  }
   0x1   :  { %4128 = sst [smem:[#allocation32_spill]] %s4106_s0 }
   0x2   :  { %4129 = sst [smem:[#allocation33_spill]] %s4107_s1 }
   0x3   :  { %4130 = sst [smem:[#allocation34_spill]] %s4109_s3 }
   0x4   :  { %4131 = sst [smem:[#allocation35_spill]] %s4118_s12 }
   0x5   :  { %17 = vsyncpa [#allocation3], 0 }
   0x6   :  { %19 = vsyncpa [#allocation3 + $0x1], 0 }
   0x7   :  { %20 = vsyncpa [#allocation6], 0 }
   0x8   :  { %21 = vsyncpa [#allocation9], 0 }
   0x9   :  { %22 = vsyncpa [#allocation12], 0 }
   0xa   :  { %23 = vsyncpa [#allocation15], 0 }
   0xb   :  { %24 = vsyncpa [#allocation18], 0 }
   0xc   :  { %25 = vsyncpa [#allocation21], 0 }
   0xd   :  { %26 = vsyncpa [#allocation4], 0 }
   0xe   :  { %28 = vsyncpa [#allocation4 + $0x1], 0  ;;  %s3288_s21 = smov 0   ;;  %s3290_s22 = smov 0  }
   0xf   :  { %s3292_s23 = smov 0   ;;  %s3294_s24 = smov 0  }
  0x10 LB: > { %s3195_s25 = smov [#allocation5]   ;;  %s3309_s27 = sadd.s32 4294967295, %s3193_s24   ;;  %s3193_s24 = sphi %s3294_s24, %s4168_s24   ;;  %s3189_s23 = sphi %s3292_s23, %s4167_s23   ;;  %s3185_s22 = sphi %s3290_s22, %s4166_s22   ;;  %s3181_s21 = sphi %s3288_s21, %s4165_s21  }
  0x11   : > { %s335_s26 = sshll.u32 %s3195_s25, 4  ;;  %p2199_p0 = scmp.ge.s32.totalorder %s3193_s24, 1  ;;  %s3314_s26 = int_to_ptr.vmem [resolvable:$true] %s335_s26 }
  0x12   : > { %p4122_p1 = scmp.eq.s32.totalorder %s3309_s27, 0  ;;  %p322_p2 = scmp.lt.s32.totalorder %s3193_s24, 3 }
  0x13   : > { %s3196_s29 = smov [#allocation8]   ;;  %s3197_s14 = smov [#allocation11]  }
  0x14   : > { %p3316_p3 = pnand %p2199_p0, %p322_p2  ;;  %s356_s30 = sshll.u32 %s3196_s29, 4  ;;  %s3323_s30 = int_to_ptr.vmem [resolvable:$true] %s356_s30 }
  0x15   : > { %s382_s15 = sshll.u32 %s3197_s14, 4  ;;  %s4135_s1 = sld [smem:[#allocation33_spill]]  ;;  %s3331_s15 = int_to_ptr.vmem [resolvable:$true] %s382_s15 }
  0x16   : > { %s4132_s28 = scalar_select %p3316_p3, 1, 0 }
  0x17   : > { %p2529_p5 = pneg %p3316_p3 }
  0x18   : > { %4133 = sst [smem:[#allocation31_spill]] %s4132_s28 }
  0x19   : > { %p3327_p6 = pnand %p2529_p5, %p4122_p1 }
  0x1b   : > { %s2765_s18 = scalar_lea.hbm %s4135_s1, 16  ;;  %p3341_p8 = pneg %p3327_p6 }
  0x1c   : > { %p2766_p7 = scmp.ne.s32.totalorder %s4135_s1, %s2765_s18  ;;  %p2772_p11 = scmp.lt.u32.totalorder %s2765_s18, %s4135_s1 }
  0x1e   : > { %p2768_p9 = pnand %p3341_p8, %p2766_p7 }
  0x20   : > { %p2769_p10 = pneg %p2768_p9 }
  0x22   : > { %p2774_p12 = pnand %p2772_p11, %p2769_p10 }
  0x24   : > { %2777 = shalt.err (!%p2774_p12)
}
  0x25   : > { %s2778_s16 = scalar_lea.vmem %s3314_s26, 16  ;;  %s2785_s17 = scalar_lea.vmem %s3314_s26, 32 }
  0x26   : > { %p2779_p13 = scmp.ne.s32.totalorder %s3314_s26, %s2778_s16  ;;  %p2786_p5 = scmp.lt.s32.totalorder %s3314_s26, %s3314_s26 }
  0x27   : > { %p2787_p7 = scmp.lt.s32.totalorder %s2785_s17, %s2778_s16 }
  0x28   : > { %p2781_p0 = pnand %p2779_p13, %p3341_p8 }
  0x29   : > { %p2788_p9 = por %p2787_p7, %p2786_p5 }
  0x2a   : > { %p2782_p2 = pneg %p2781_p0 }
  0x2c   : > { %p2789_p4 = pnand %p2788_p9, %p2782_p2 }
  0x2e   : > { %2792 = shalt.err (!%p2789_p4)
}
  0x2f   : > { %2532 = dma.hbm_to_vmem [thread:$0]  (!%p3327_p6), %s4135_s1, 16, %s3314_s26, [#allocation6]  }
  0x30   : > { %s4137_s3 = sld [smem:[#allocation34_spill]] }
  0x36   : > { %s2793_s14 = scalar_lea.hbm %s4137_s3, 512 }
  0x37   : > { %p2794_p10 = scmp.ne.s32.totalorder %s4137_s3, %s2793_s14  ;;  %p2800_p4 = scmp.lt.u32.totalorder %s2793_s14, %s4137_s3 }
  0x39   : > { %p2796_p11 = pnand %p2794_p10, %p3341_p8 }
  0x3b   : > { %p2797_p12 = pneg %p2796_p11 }
  0x3d   : > { %p2802_p13 = pnand %p2800_p4, %p2797_p12 }
  0x3f   : > { %2805 = shalt.err (!%p2802_p13)
}
  0x40   : > { %s2806_s26 = scalar_lea.vmem %s3323_s30, 512  ;;  %p2814_p7 = scmp.lt.s32.totalorder %s3323_s30, %s3323_s30 }
  0x41   : > { %p2807_p0 = scmp.ne.s32.totalorder %s3323_s30, %s2806_s26  ;;  %p2815_p9 = scmp.lt.s32.totalorder %s2806_s26, %s2806_s26 }
  0x43   : > { %p2809_p2 = pnand %p2807_p0, %p3341_p8  ;;  %p2816_p10 = por %p2815_p9, %p2814_p7 }
  0x45   : > { %p2810_p5 = pneg %p2809_p2 }
  0x47   : > { %p2817_p11 = pnand %p2816_p10, %p2810_p5 }
  0x49   : > { %2820 = shalt.err (!%p2817_p11)
}
  0x4a   : > { %s3198_s12 = smov 64   ;;  %s3199_s28 = smov 4  }
  0x4b   : > { %2538 = dma.hbm_to_vmem [thread:$0]  (!%p3327_p6), %s4137_s3, 512, %s3323_s30, [#allocation9], %s3198_s12, %s3198_s12, %s3199_s28  }
  0x4c   : > { %s2821_s14 = scalar_lea.hbm %s4111_s5, 512 }
  0x4d   : > { %p2822_p12 = scmp.ne.s32.totalorder %s4111_s5, %s2821_s14  ;;  %p2828_p0 = scmp.lt.u32.totalorder %s2821_s14, %s4111_s5 }
  0x4f   : > { %p2824_p4 = pnand %p2822_p12, %p3341_p8 }
  0x51   : > { %p2825_p13 = pneg %p2824_p4 }
  0x53   : > { %p2830_p2 = pnand %p2828_p0, %p2825_p13 }
  0x55   : > { %2833 = shalt.err (!%p2830_p2)
}
  0x56   : > { %s2834_s30 = scalar_lea.vmem %s3331_s15, 512  ;;  %p2842_p10 = scmp.lt.s32.totalorder %s3331_s15, %s3331_s15 }
  0x57   : > { %p2835_p5 = scmp.ne.s32.totalorder %s3331_s15, %s2834_s30  ;;  %p2843_p11 = scmp.lt.s32.totalorder %s2834_s30, %s2834_s30 }
  0x59   : > { %p2837_p7 = pnand %p2835_p5, %p3341_p8  ;;  %p2844_p12 = por %p2843_p11, %p2842_p10 }
  0x5b   : > { %p2838_p9 = pneg %p2837_p7 }
  0x5d   : > { %p2845_p4 = pnand %p2844_p12, %p2838_p9 }
  0x5f   : > { %2848 = shalt.err (!%p2845_p4)
}
  0x60   : > { %2544 = dma.hbm_to_vmem [thread:$0]  (!%p3327_p6), %s4111_s5, 512, %s3331_s15, [#allocation12], %s3198_s12, %s3198_s12, %s3199_s28  }
  0x61   : > { %s3200_s19 = smov [#allocation14]   ;;  %s3201_s29 = smov [#allocation17]  }
  0x62   : > { %s408_s20 = sshll.u32 %s3200_s19, 4  ;;  %s434_s14 = sshll.u32 %s3201_s29, 4  ;;  %s409_s20 = int_to_ptr.vmem [resolvable:$true] %s408_s20  ;;  %s435_s14 = int_to_ptr.vmem [resolvable:$true] %s434_s14 }
  0x63   : > { %s2849_s26 = scalar_lea.hbm %s4113_s7, 512 }
  0x64   : > { %p2850_p13 = scmp.ne.s32.totalorder %s4113_s7, %s2849_s26  ;;  %p2856_p5 = scmp.lt.u32.totalorder %s2849_s26, %s4113_s7 }
  0x66   : > { %p2852_p0 = pnand %p2850_p13, %p3341_p8 }
  0x68   : > { %p2853_p2 = pneg %p2852_p0 }
  0x6a   : > { %p2858_p7 = pnand %p2856_p5, %p2853_p2 }
  0x6c   : > { %2861 = shalt.err (!%p2858_p7)
}
  0x6d   : > { %s2862_s15 = scalar_lea.vmem %s409_s20, 512  ;;  %p2870_p12 = scmp.lt.s32.totalorder %s409_s20, %s409_s20 }
  0x6e   : > { %p2863_p9 = scmp.ne.s32.totalorder %s409_s20, %s2862_s15  ;;  %p2871_p4 = scmp.lt.s32.totalorder %s2862_s15, %s2862_s15 }
  0x70   : > { %p2865_p10 = pnand %p2863_p9, %p3341_p8  ;;  %p2872_p1 = por %p2871_p4, %p2870_p12 }
  0x72   : > { %p2866_p11 = pneg %p2865_p10 }
  0x74   : > { %p2873_p3 = pnand %p2872_p1, %p2866_p11 }
  0x76   : > { %2876 = shalt.err (!%p2873_p3)
}
  0x77   : > { %2550 = dma.hbm_to_vmem [thread:$0]  (!%p3327_p6), %s4113_s7, 512, %s409_s20, [#allocation15], %s3198_s12, %s3198_s12, %s3199_s28  }
  0x78   : > { %s2877_s29 = scalar_lea.hbm %s4115_s9, 512 }
  0x79   : > { %p2878_p1 = scmp.ne.s32.totalorder %s4115_s9, %s2877_s29  ;;  %p2884_p0 = scmp.lt.u32.totalorder %s2877_s29, %s4115_s9 }
  0x7b   : > { %p2880_p3 = pnand %p2878_p1, %p3341_p8 }
  0x7d   : > { %p2881_p13 = pneg %p2880_p3 }
  0x7f   : > { %p2886_p2 = pnand %p2884_p0, %p2881_p13 }
  0x81   : > { %2889 = shalt.err (!%p2886_p2)
}
  0x82   : > { %s2890_s1 = scalar_lea.vmem %s435_s14, 512  ;;  %p2898_p10 = scmp.lt.s32.totalorder %s435_s14, %s435_s14 }
  0x83   : > { %p2891_p5 = scmp.ne.s32.totalorder %s435_s14, %s2890_s1  ;;  %p2899_p11 = scmp.lt.s32.totalorder %s2890_s1, %s2890_s1 }
  0x85   : > { %p2893_p7 = pnand %p2891_p5, %p3341_p8  ;;  %p2900_p12 = por %p2899_p11, %p2898_p10 }
  0x87   : > { %p2894_p9 = pneg %p2893_p7 }
  0x89   : > { %p2901_p4 = pnand %p2900_p12, %p2894_p9 }
  0x8b   : > { %2904 = shalt.err (!%p2901_p4)
}
  0x8c   : > { %2556 = dma.hbm_to_vmem [thread:$0]  (!%p3327_p6), %s4115_s9, 512, %s435_s14, [#allocation18], %s3198_s12, %s3198_s12, %s3199_s28  }
  0x8d   : > { %s3202_s0 = smov [#allocation7]   ;;  %s3203_s18 = smov [#allocation10]  }
  0x8e   : > { %s346_s3 = sshll.u32 %s3202_s0, 4  ;;  %s369_s19 = sshll.u32 %s3203_s18, 4  ;;  %s347_s3 = int_to_ptr.vmem [resolvable:$true] %s346_s3  ;;  %s370_s19 = int_to_ptr.vmem [resolvable:$true] %s369_s19 }
  0x8f   : > { %s2905_s17 = scalar_lea.hbm %s4108_s2, 16 }
  0x90   : > { %p2906_p1 = scmp.ne.s32.totalorder %s4108_s2, %s2905_s17  ;;  %p2912_p0 = scmp.lt.u32.totalorder %s2905_s17, %s4108_s2 }
  0x92   : > { %p2908_p3 = pnand %p2906_p1, %p3341_p8 }
  0x94   : > { %p2909_p13 = pneg %p2908_p3 }
  0x96   : > { %p2914_p2 = pnand %p2912_p0, %p2909_p13 }
  0x98   : > { %2917 = shalt.err (!%p2914_p2)
}
  0x99   : > { %s2918_s14 = scalar_lea.vmem %s347_s3, 16  ;;  %s2925_s15 = scalar_lea.vmem %s347_s3, 32 }
  0x9a   : > { %p2919_p5 = scmp.ne.s32.totalorder %s347_s3, %s2918_s14  ;;  %p2926_p10 = scmp.lt.s32.totalorder %s347_s3, %s347_s3 }
  0x9b   : > { %p2927_p11 = scmp.lt.s32.totalorder %s2925_s15, %s2918_s14 }
  0x9c   : > { %p2921_p7 = pnand %p2919_p5, %p3341_p8 }
  0x9d   : > { %p2928_p12 = por %p2927_p11, %p2926_p10 }
  0x9e   : > { %p2922_p9 = pneg %p2921_p7 }
  0xa0   : > { %p2929_p4 = pnand %p2928_p12, %p2922_p9 }
  0xa2   : > { %2932 = shalt.err (!%p2929_p4)
}
  0xa3   : > { %2535 = dma.hbm_to_vmem [thread:$0]  (!%p3327_p6), %s4108_s2, 16, %s347_s3, [#allocation6]  }
  0xa4   : > { %s2933_s17 = scalar_lea.hbm %s4110_s4, 512 }
  0xa5   : > { %p2934_p1 = scmp.ne.s32.totalorder %s4110_s4, %s2933_s17  ;;  %p2940_p0 = scmp.lt.u32.totalorder %s2933_s17, %s4110_s4 }
  0xa7   : > { %p2936_p3 = pnand %p2934_p1, %p3341_p8 }
  0xa9   : > { %p2937_p13 = pneg %p2936_p3 }
  0xab   : > { %p2942_p2 = pnand %p2940_p0, %p2937_p13 }
  0xad   : > { %2945 = shalt.err (!%p2942_p2)
}
  0xae   : > { %s2946_s14 = scalar_lea.vmem %s370_s19, 512  ;;  %p2954_p10 = scmp.lt.s32.totalorder %s370_s19, %s370_s19 }
  0xaf   : > { %p2947_p5 = scmp.ne.s32.totalorder %s370_s19, %s2946_s14  ;;  %p2955_p11 = scmp.lt.s32.totalorder %s2946_s14, %s2946_s14 }
  0xb1   : > { %p2949_p7 = pnand %p2947_p5, %p3341_p8  ;;  %p2956_p12 = por %p2955_p11, %p2954_p10 }
  0xb3   : > { %p2950_p9 = pneg %p2949_p7 }
  0xb5   : > { %p2957_p4 = pnand %p2956_p12, %p2950_p9 }
  0xb7   : > { %2960 = shalt.err (!%p2957_p4)
}
  0xb8   : > { %2541 = dma.hbm_to_vmem [thread:$0]  (!%p3327_p6), %s4110_s4, 512, %s370_s19, [#allocation9], %s3198_s12, %s3198_s12, %s3199_s28  }
  0xb9   : > { %s3204_s0 = smov [#allocation13]   ;;  %s3205_s29 = smov [#allocation16]  }
  0xba   : > { %s395_s18 = sshll.u32 %s3204_s0, 4  ;;  %s421_s16 = sshll.u32 %s3205_s29, 4  ;;  %s396_s18 = int_to_ptr.vmem [resolvable:$true] %s395_s18  ;;  %s422_s16 = int_to_ptr.vmem [resolvable:$true] %s421_s16 }
  0xbb   : > { %s2961_s30 = scalar_lea.hbm %s4112_s6, 512 }
  0xbc   : > { %p2962_p1 = scmp.ne.s32.totalorder %s4112_s6, %s2961_s30  ;;  %p2968_p0 = scmp.lt.u32.totalorder %s2961_s30, %s4112_s6 }
  0xbe   : > { %p2964_p3 = pnand %p2962_p1, %p3341_p8 }
  0xc0   : > { %p2965_p13 = pneg %p2964_p3 }
  0xc2   : > { %p2970_p2 = pnand %p2968_p0, %p2965_p13 }
  0xc4   : > { %2973 = shalt.err (!%p2970_p2)
}
  0xc5   : > { %s2974_s19 = scalar_lea.vmem %s396_s18, 512  ;;  %p2982_p10 = scmp.lt.s32.totalorder %s396_s18, %s396_s18 }
  0xc6   : > { %p2975_p5 = scmp.ne.s32.totalorder %s396_s18, %s2974_s19  ;;  %p2983_p11 = scmp.lt.s32.totalorder %s2974_s19, %s2974_s19 }
  0xc8   : > { %p2977_p7 = pnand %p2975_p5, %p3341_p8  ;;  %p2984_p12 = por %p2983_p11, %p2982_p10 }
  0xca   : > { %p2978_p9 = pneg %p2977_p7 }
  0xcc   : > { %p2985_p4 = pnand %p2984_p12, %p2978_p9 }
  0xce   : > { %2988 = shalt.err (!%p2985_p4)
}
  0xcf   : > { %2547 = dma.hbm_to_vmem [thread:$0]  (!%p3327_p6), %s4112_s6, 512, %s396_s18, [#allocation12], %s3198_s12, %s3198_s12, %s3199_s28  }
  0xd0   : > { %s2989_s26 = scalar_lea.hbm %s4114_s8, 1024 }
  0xd1   : > { %p2990_p1 = scmp.ne.s32.totalorder %s4114_s8, %s2989_s26  ;;  %p2996_p0 = scmp.lt.u32.totalorder %s2989_s26, %s4114_s8 }
  0xd3   : > { %p2992_p3 = pnand %p2990_p1, %p3341_p8 }
  0xd5   : > { %p2993_p13 = pneg %p2992_p3 }
  0xd7   : > { %p2998_p2 = pnand %p2996_p0, %p2993_p13 }
  0xd9   : > { %3001 = shalt.err (!%p2998_p2)
}
  0xda   : > { %s3002_s3 = scalar_lea.vmem %s422_s16, 1024  ;;  %p3010_p10 = scmp.lt.s32.totalorder %s422_s16, %s422_s16 }
  0xdb   : > { %p3003_p5 = scmp.ne.s32.totalorder %s422_s16, %s3002_s3  ;;  %p3011_p11 = scmp.lt.s32.totalorder %s3002_s3, %s3002_s3 }
  0xdd   : > { %p3005_p7 = pnand %p3003_p5, %p3341_p8  ;;  %p3012_p12 = por %p3011_p11, %p3010_p10 }
  0xdf   : > { %p3006_p9 = pneg %p3005_p7 }
  0xe1   : > { %p3013_p4 = pnand %p3012_p12, %p3006_p9 }
  0xe3   : > { %3016 = shalt.err (!%p3013_p4)
}
  0xe4   : > { %2553 = dma.hbm_to_vmem [thread:$0]  (!%p3327_p6), %s4114_s8, 1024, %s422_s16, [#allocation15], %s3198_s12, %s3198_s12, %s3199_s28  }
  0xe5   : > { %s3206_s15 = smov [#allocation19]   ;;  %s3017_s26 = scalar_lea.hbm %s4116_s10, 256 }
  0xe6   : > { %s447_s0 = sshll.u32 %s3206_s15, 4  ;;  %p3018_p1 = scmp.ne.s32.totalorder %s4116_s10, %s3017_s26  ;;  %s448_s0 = int_to_ptr.vmem [resolvable:$true] %s447_s0 }
  0xe7   : > { %p3024_p0 = scmp.lt.u32.totalorder %s3017_s26, %s4116_s10 }
  0xe8   : > { %p3020_p3 = pnand %p3018_p1, %p3341_p8 }
  0xea   : > { %p3021_p13 = pneg %p3020_p3 }
  0xec   : > { %p3026_p2 = pnand %p3024_p0, %p3021_p13 }
  0xee   : > { %3029 = shalt.err (!%p3026_p2)
}
  0xef   : > { %s3030_s12 = scalar_lea.vmem %s448_s0, 256  ;;  %p3038_p10 = scmp.lt.s32.totalorder %s448_s0, %s448_s0 }
  0xf0   : > { %p3031_p5 = scmp.ne.s32.totalorder %s448_s0, %s3030_s12  ;;  %p3039_p11 = scmp.lt.s32.totalorder %s3030_s12, %s3030_s12 }
  0xf2   : > { %p3033_p7 = pnand %p3031_p5, %p3341_p8  ;;  %p3040_p12 = por %p3039_p11, %p3038_p10 }
  0xf4   : > { %p3034_p9 = pneg %p3033_p7 }
  0xf6   : > { %p3041_p4 = pnand %p3040_p12, %p3034_p9 }
  0xf8   : > { %3044 = shalt.err (!%p3041_p4)
}
  0xf9   : > { %s4124_s28 = smov 128   ;;  %s4125_s16 = smov 8  }
  0xfa   : > { %2559 = dma.hbm_to_vmem [thread:$0]  (!%p3327_p6), %s4116_s10, 256, %s448_s0, [#allocation18], %s4124_s28, %s4124_s28, %s4125_s16  }
  0xfb   : > { %s3209_s19 = smov [#allocation20]   ;;  %s3045_s26 = scalar_lea.hbm %s4117_s11, 256 }
  0xfc   : > { %s460_s15 = sshll.u32 %s3209_s19, 4  ;;  %p3046_p1 = scmp.ne.s32.totalorder %s4117_s11, %s3045_s26  ;;  %s461_s15 = int_to_ptr.vmem [resolvable:$true] %s460_s15 }
  0xfd   : > { %p3052_p0 = scmp.lt.u32.totalorder %s3045_s26, %s4117_s11 }
  0xfe   : > { %p3048_p3 = pnand %p3046_p1, %p3341_p8 }
 0x100   : > { %p3049_p13 = pneg %p3048_p3 }
 0x102   : > { %p3054_p2 = pnand %p3052_p0, %p3049_p13 }
 0x104   : > { %3057 = shalt.err (!%p3054_p2)
}
 0x105   : > { %s3058_s0 = scalar_lea.vmem %s461_s15, 256  ;;  %p3066_p10 = scmp.lt.s32.totalorder %s461_s15, %s461_s15 }
 0x106   : > { %p3059_p5 = scmp.ne.s32.totalorder %s461_s15, %s3058_s0  ;;  %p3067_p11 = scmp.lt.s32.totalorder %s3058_s0, %s3058_s0 }
 0x108   : > { %p3061_p7 = pnand %p3059_p5, %p3341_p8  ;;  %p3068_p12 = por %p3067_p11, %p3066_p10 }
 0x10a   : > { %p3062_p9 = pneg %p3061_p7 }
 0x10c   : > { %p3069_p4 = pnand %p3068_p12, %p3062_p9 }
 0x10e   : > { %3072 = shalt.err (!%p3069_p4)
}
 0x10f   : > { %2562 = dma.hbm_to_vmem [thread:$0]  (!%p3327_p6), %s4117_s11, 256, %s461_s15, [#allocation21], %s4124_s28, %s4124_s28, %s4125_s16  }
 0x110   : > { %s2198_s13 = sadd.s32 4294967294, %s3193_s24   ;;  %s3582_s25 = sadd.s32 1, %s3193_s24  }
 0x111   : > { %s41_s18 = sadd.s32 1, %s3189_s23  ;;  %s38_s19 = ssub.s32 %s3193_s24, %s3582_s25 }
 0x112   : > { %p48_p8 = scmp.ne.s32.totalorder %s3189_s23, %s3185_s22  ;;  %p39_p1 = scmp.eq.s32.totalorder %s38_s19, 0 }
 0x113   : > { %p49_p3 = scmp.eq.s32.totalorder %s3193_s24, 0  ;;  %p54_p13 = scmp.ne.s32.totalorder %s3185_s22, %s3181_s21 }
 0x114   : > { %p309_p0 = scmp.eq.s32.totalorder %s3309_s27, 1  ;;  %p4138_p5 = scmp.eq.s32.totalorder %s3309_s27, 0 }
 0x115   : > { %s3594_s29 = scalar_select %p39_p1, %s3189_s23, %s41_s18  }
 0x116   : > { %p50_p2 = por %p49_p3, %p48_p8  ;;  %p3598_p7 = por %p4138_p5, %p54_p13 }
 0x117   : > { %p3602_p6 = por %p309_p0, %p48_p8  ;;  %p315_p9 = scmp.eq.s32.totalorder %s2198_s13, 1 }
 0x118   : > { %p2582_p10 = scmp.lt.s32.totalorder %s3193_s24, 2  ;;  %s474_s26 = sand.u32 1, %s3189_s23  }
 0x119   : > { %s4140_s15 = scalar_select %p3602_p6, 1, 0 }
 0x11a   : > { %p3608_p11 = por %p315_p9, %p54_p13  ;;  %s2212_s1 = sshll.u32 %s474_s26, 4 }
 0x11b   : > { %s2284_s20 = sshll.u32 %s3193_s24, 8  ;;  %s4142_s12 = sld [smem:[#allocation32_spill]] }
 0x11c   : > { %s4141_s30 = scalar_select %p3608_p11, 1, 0 }
 0x11d   : > { %s478_s18 = scalar_lea.vmem [#allocation2], %s2212_s1  ;;  %p3618_p12 = pnand %p2582_p10, %p50_p2 }
 0x11e   : > { %s485_s19 = sshll.u32 %s478_s18, 4  ;;  %s3624_s28 = scalar_lea.sflag [#allocation3], %s474_s26  ;;  %s3622_s19 = int_to_ptr.vmem [resolvable:$true] %s485_s19 }
 0x11f   : > { %p3075_p8 = pneg %p3618_p12 }
 0x121   : > { %s3616_s3 = scalar_lea.hbm %s4142_s12, %s2284_s20  ;;  %s3078_s14 = scalar_lea.hbm %s4142_s12, 512 }
 0x122   : > { %s3073_s16 = scalar_lea.hbm %s3616_s3, 256  ;;  %p3079_p13 = scmp.lt.u32.totalorder %s3616_s3, %s4142_s12 }
 0x123   : > { %p3074_p4 = scmp.ne.s32.totalorder %s3616_s3, %s3073_s16  ;;  %p3080_p0 = scmp.lt.u32.totalorder %s3078_s14, %s3073_s16 }
 0x124   : > { %p3082_p5 = scmp.lt.u32.totalorder %s3073_s16, %s3616_s3 }
 0x125   : > { %p3076_p1 = pnand %p3075_p8, %p3074_p4  ;;  %p3081_p2 = por %p3080_p0, %p3079_p13 }
 0x127   : > { %p3077_p3 = pneg %p3076_p1  ;;  %p3083_p9 = por %p3082_p5, %p3081_p2 }
 0x129   : > { %p3084_p10 = pnand %p3083_p9, %p3077_p3 }
 0x12b   : > { %3087 = shalt.err (!%p3084_p10)
}
 0x12c   : > { %s3088_s26 = scalar_lea.vmem %s3622_s19, 256  ;;  %s3210_s1 = smov [#allocation2]  }
 0x12d   : > { %p3089_p4 = scmp.ne.s32.totalorder %s3622_s19, %s3088_s26  ;;  %s3093_s20 = sshll.u32 %s3210_s1, 4  ;;  %s3094_s20 = int_to_ptr.vmem [resolvable:$false] %s3093_s20 }
 0x12e   : > { %s3095_s0 = scalar_lea.vmem %s3094_s20, 512  ;;  %p3096_p6 = scmp.lt.s32.totalorder %s3622_s19, %s3094_s20 }
 0x12f   : > { %p3091_p1 = pnand %p3089_p4, %p3075_p8  ;;  %p3097_p13 = scmp.lt.s32.totalorder %s3095_s0, %s3088_s26 }
 0x131   : > { %p3092_p11 = pneg %p3091_p1  ;;  %p3098_p0 = por %p3097_p13, %p3096_p6 }
 0x133   : > { %p3099_p2 = pnand %p3098_p0, %p3092_p11 }
 0x135   : > { %3102 = shalt.err (!%p3099_p2)
}
 0x136   : > { %s4144_s16 = smov 8   ;;  %s4145_s14 = smov 128  }
 0x137   : > { %2566 = dma.hbm_to_vmem [thread:$0]  (!%p3618_p12), %s3616_s3, 256, %s3622_s19, %s3624_s28, %s4145_s14, %s4145_s14, %s4144_s16  }
 0x138   : > { %s4146_s18 = sld [smem:[#allocation31_spill]] }
 0x13e   : > { %p4147_p8 = scmp.ne.s32.totalorder %s4146_s18, 0 }
 0x13f   : > { %s3658_s1 = sand.u32 (!%p4147_p8), 1, %s3185_s22  }
 0x140   : > { %497 = sbr.rel (%p4147_p8) target bundleno = 2800 (0xaf0), region = 68  ;;  %s2216_s26 = sshll.u32 (!%p4147_p8), %s3658_s1, 4 }
 0x141   : > { %s500_s20 = scalar_lea.sflag (!%p4147_p8), [#allocation3], %s3658_s1  ;;  %s3664_s13 = scalar_lea.vmem (!%p4147_p8), [#allocation2], %s2216_s26 }
 0x147   : > { %3148 = dma.done.wait (%p3598_p7), %s500_s20, 256  }
 0x148   : > { %3150 = vsyncadd (%p3598_p7), %s500_s20, 4294967040  ;;  %p4148_p6 = scmp.eq.s32.totalorder %s3309_s27, 0 }
 0x14a   : > { %3152 = dma.done.wait (%p4148_p6), [#allocation6], 32   ;;  %p4149_p11 = pmov %p4148_p6 }
 0x14b   : > { %p4150_p12 = pmov %p4148_p6 }
 0x14c   : > { %3154 = vsyncadd (%p4149_p11), [#allocation6], 4294967264 }
 0x14d   : > { %3156 = dma.done.wait (%p4150_p12), [#allocation9], 1024   ;;  %p4151_p3 = pmov %p4148_p6 }
 0x14f   : > { %3158 = vsyncadd (%p4151_p3), [#allocation9], 4294966272  ;;  %p4152_p5 = pmov %p4151_p3 }
 0x150   : > { %p4153_p9 = pmov %p4151_p3 }
 0x151   : > { %3160 = dma.done.wait (%p4152_p5), [#allocation12], 1024  }
 0x152   : > { %3162 = vsyncadd (%p4153_p9), [#allocation12], 4294966272  ;;  %p4154_p7 = pmov %p4151_p3 }
 0x153   : > { %p4155_p10 = pmov %p4151_p3 }
 0x154   : > { %3164 = dma.done.wait (%p4154_p7), [#allocation15], 1536  }
 0x155   : > { %3166 = vsyncadd (%p4155_p10), [#allocation15], 4294965760  ;;  %p4156_p4 = pmov %p4151_p3 }
 0x156   : > { %p4157_p1 = pmov %p4151_p3 }
 0x157   : > { %3168 = dma.done.wait (%p4156_p4), [#allocation18], 768  }
 0x158   : > { %3170 = vsyncadd (%p4157_p1), [#allocation18], 4294966528  ;;  %p4158_p13 = pmov %p4157_p1 }
 0x159   : > { %p4159_p0 = pmov %p4157_p1 }
 0x15a   : > { %3172 = dma.done.wait (%p4158_p13), [#allocation21], 256  }
 0x15b   : > { %3174 = vsyncadd (%p4159_p0), [#allocation21], 4294967040  ;;  %v589_v0 = vld [vmem:[%s3664_s13] sm:$0xff]  ;;  %vm593_vm0 = vcmask 523264   ;;  %v590_v1 = vld [vmem:[%s3664_s13 + $0x8] sm:$0xff]  ;;  %v3211_v7 = vmov 0.0  }
 0x15c   : > { %v591_v2 = vmul.f32 %v589_v0, %v589_v0  ;;  %v592_v3 = vmul.f32 %v590_v1, %v590_v1  ;;  %v2683_v6 = vld [vmem:[#allocation8] sm:$0xff]   ;;  %2341 = vmatprep.subr.bf16.mxu0 %v3211_v7  ;;  %2353 = vmatprep.subr.bf16.mxu1 %v3211_v7  ;;  %v2685_v9 = vld [vmem:[#allocation8 + $0x8] sm:$0xff]   ;;  %vm3212_vm1 = vmmov 0   ;;  %v2687_v11 = vld [vmem:[#allocation8 + $0x10] sm:$0xff]   ;;  %s3213_s28 = smov 112   ;;  %s3214_s17 = smov 96  }
 0x15d   : > { %v2684_v8 = vld [vmem:[#allocation10] sm:$0xff]   ;;  %2342 = vmatpush3.bf16.msra.mxu0 %v2683_v6  ;;  %2349 = vmatprep.mubr.msk.bf16.mxu0 %vm3212_vm1, %v3211_v7  ;;  %v2686_v10 = vld [vmem:[#allocation10 + $0x8] sm:$0xff]   ;;  %v2688_v12 = vld [vmem:[#allocation10 + $0x10] sm:$0xff]   ;;  %s3215_s3 = smov 80   ;;  %s4127_s19 = smov 8   ;;  %vm977_vm2 = vcmask 64512  }
 0x15e   : > { %v594_v4 = vsel %vm593_vm0, %v591_v2, 0.0  ;;  %v597_v5 = vsel %vm593_vm0, %v592_v3, 0.0  ;;  %2354 = vmatpush3.bf16.msra.mxu1 %v2684_v8  ;;  %2343 = vmatprep.subr.bf16.mxu0 %v3211_v7  ;;  %v2689_v13 = vld [vmem:[#allocation8 + $0x18] sm:$0xff]   ;;  %v2691_v28 = vld [vmem:[#allocation11] sm:$0xff]   ;;  %v2692_v30 = vld [vmem:[#allocation11 + $0x8] sm:$0xff]   ;;  %s3217_s0 = smov 120  }
 0x15f   : > { %595 = vadd.xlane.f32.xlu0 %v594_v4  ;;  %2355 = vmatprep.subr.bf16.mxu1 %v3211_v7  ;;  %v2690_v14 = vld [vmem:[#allocation10 + $0x18] sm:$0xff]   ;;  %v2693_v31 = vld [vmem:[#allocation11 + $0x10] sm:$0xff]   ;;  %vm1121_vm3 = vcmask 130048   ;;  %s3218_s16 = smov 32   ;;  %s3219_s14 = smov 16   ;;  %vm1620_vm6 = vcmask 261120  }
 0x160   : > { %2361 = vmatprep.mubr.msk.bf16.mxu1 %vm3212_vm1, %v3211_v7  ;;  %v2229_v24 = vld [vmem:[#allocation5] ss:$0 sm:$0xff]  ;;  %s3220_s18 = smov 48   ;;  %vm1623_vm7 = vcmask 392192   ;;  %s587_s20 = scalar_lea.vmem [#allocation22], %s2216_s26 }
 0x161   : > { %2344 = vmatpush3.bf16.msra.mxu0 %v2685_v9  ;;  %v2694_v32 = vld [vmem:[#allocation11 + $0x18] sm:$0xff]   ;;  %p4161_p8 = scmp.ne.s32.totalorder %s4140_s15, 0 }
 0x162   : > { %2356 = vmatpush3.bf16.msra.mxu1 %v2686_v10  ;;  %2345 = vmatprep.subr.bf16.mxu0 %v3211_v7 }
 0x163   : > { %598 = vadd.xlane.f32.xlu0 %v597_v5  ;;  %2357 = vmatprep.subr.bf16.mxu1 %v3211_v7 }
 0x165   : > { %2346 = vmatpush3.bf16.msra.mxu0 %v2687_v11 }
 0x166   : > { %2358 = vmatpush3.bf16.msra.mxu1 %v2688_v12  ;;  %2347 = vmatprep.subr.bf16.mxu0 %v3211_v7 }
 0x167   : > { %2359 = vmatprep.subr.bf16.mxu1 %v3211_v7 }
 0x169   : > { %2348 = vmatpush3.bf16.msra.mxu0 %v2689_v13 }
 0x16a   : > { %2360 = vmatpush3.bf16.msra.mxu1 %v2690_v14  ;;  %2365 = vmatprep.subr.bf16.mxu0 %v3211_v7  ;;  %v3841_v14 = vld [vmem:[#allocation20 + $0x8] sm:$0xff] }
 0x16b   : > { %2383 = vmatprep.subr.bf16.mxu1 %v3211_v7 }
 0x1ec   : > { %v596_v15 = vpop.xlane.xlu0 %595 }
 0x1ed   : > { %v601_v16 = vmul.f32 0.015625, %v596_v15 }
 0x1ef   : > { %v603_v17 = vadd.f32 1e-05, %v601_v16  ;;  %v3846_v16 = vld [vmem:[#allocation19] sm:$0xff] }
 0x1f0   : > { %v599_v18 = vpop.xlane.xlu0 %598 }
 0x1f1   : > { %2715 = vrsqrt.f32 %v603_v17  ;;  %v602_v19 = vmul.f32 0.015625, %v599_v18  ;;  %v3848_v17 = vld [vmem:[#allocation19 + $0x8] sm:$0xff] }
 0x1f3   : > { %v604_v20 = vadd.f32 1e-05, %v602_v19 }
 0x1f5   : > { %2717 = vrsqrt.f32 %v604_v20  ;;  %v3852_v20 = vld [vmem:[#allocation20] sm:$0xff] }
 0x1fb   : > { %v2716_v21 = vpop.eup %2715 }
 0x1fc   : > { %v607_v22 = vmul.f32 %v2716_v21, %v589_v0 }
 0x1fe   : > { %v616_v26 = vmul.f32 %v2229_v24, %v607_v22 }
 0x1ff   : > { %v2718_v23 = vpop.eup %2717 }
 0x200   : > { %v608_v25 = vmul.f32 %v2718_v23, %v590_v1 }
 0x202   : > { %v617_v27 = vmul.f32 %v2229_v24, %v608_v25 }
 0x204   : > { %v618_v29 = vpack.c.bf16 %v617_v27, %v616_v26 }
 0x206   : > { %2350 = vmatmul.mubr.msk.bf16.vlgmr.msra.gmra.mrb[0].mxu0 %vm593_vm0, %v618_v29  ;;  %2362 = vmatmul.mubr.msk.bf16.vlgmr.msra.gmra.mrb[0].mxu1 %vm593_vm0, %v618_v29 }
 0x207   : > { %2366 = vmatpush3.bf16.msra.mxu0 %v2691_v28  ;;  %2373 = vmatprep.mubr.msk.bf16.mxu0 %vm3212_vm1, %v3211_v7 }
 0x208   : > { %2367 = vmatprep.subr.bf16.mxu0 %v3211_v7  ;;  %2385 = vmatprep.mubr.msk.bf16.mxu1 %vm3212_vm1, %v3211_v7 }
 0x20b   : > { %2368 = vmatpush3.bf16.msra.mxu0 %v2692_v30 }
 0x20c   : > { %2369 = vmatprep.subr.bf16.mxu0 %v3211_v7 }
 0x20f   : > { %2370 = vmatpush3.bf16.msra.mxu0 %v2693_v31 }
 0x210   : > { %2371 = vmatprep.subr.bf16.mxu0 %v3211_v7 }
 0x213   : > { %2372 = vmatpush3.bf16.msra.mxu0 %v2694_v32 }
 0x214   : > { %2377 = vmatprep.subr.bf16.mxu0 %v3211_v7 }
 0x216   : > { %2374 = vmatmul.mubr.msk.bf16.vlgmr.msra.gmra.mrb[4].mxu0 %vm593_vm0, %v618_v29 }
 0x217   : > { %2379 = vmatprep.mubr.msk.bf16.mxu0 %vm3212_vm1, %v3211_v7 }
 0x2d9   : > { %v3725_v33 = vpop.f32.mrb[0].mxu0  ;;  %v3727_v34 = vpop.f32.mrb[0].mxu1 }
 0x2da   : > { %863 = vrot.lane.b32.xlu1 %v3727_v34, %s3213_s28  ;;  %v2363_v35 = vpop.f32.mrb[1].mxu1  ;;  %843 = vrot.lane.b32.xlu0 %v3725_v33, %s3213_s28  ;;  %v2351_v36 = vpop.f32.mrb[1].mxu0  ;;  %v1018_v49 = vsub.f32 0.0, %v3727_v34  ;;  %v913_v50 = vsub.f32 0.0, %v3725_v33  ;;  %v1010_v26 = vmul.f32 %v3846_v16, %v3727_v34 }
 0x2db   : > { %v3733_v37 = vpop.f32.mrb[2].mxu0  ;;  %v3735_v38 = vpop.f32.mrb[2].mxu1 }
 0x2dc   : > { %v2352_v39 = vpop.f32.mrb[3].mxu0  ;;  %v2364_v40 = vpop.f32.mrb[3].mxu1  ;;  %v1019_v44 = vsub.f32 0.0, %v3735_v38  ;;  %v914_v48 = vsub.f32 0.0, %v3733_v37  ;;  %v1011_v24 = vmul.f32 %v3848_v17, %v3735_v38  ;;  %v906_v30 = vmul.f32 %v3848_v17, %v3733_v37 }
 0x2de   : > { %869 = vrot.lane.b32.xlu1 %v3727_v34, %s3214_s17  ;;  %851 = vrot.lane.b32.xlu0 %v3733_v37, %s3214_s17 }
 0x2e2   : > { %875 = vrot.lane.b32.xlu1 %v3727_v34, %s3215_s3  ;;  %857 = vrot.lane.b32.xlu0 %v3733_v37, %s3215_s3 }
 0x2e6   : > { %849 = vrot.lane.b32.xlu1 %v3725_v33, %s3214_s17  ;;  %1060 = vrot.lane.b32.xlu0 %v3735_v38, %s4127_s19 }
 0x2e9   : > { %v3749_v41 = vpop.f32.mrb[4].mxu0 }
 0x2ea   : > { %v2375_v42 = vpop.f32.mrb[5].mxu0  ;;  %865 = vrot.lane.b32.xlu1 %v3735_v38, %s3213_s28  ;;  %955 = vrot.lane.b32.xlu0 %v3733_v37, %s4127_s19 }
 0x2eb   : > { %v3755_v43 = vpop.f32.mrb[6].mxu0 }
 0x2ec   : > { %v1414_v45 = vpack.c.bf16 %v3755_v43, %v3749_v41  ;;  %v2376_v46 = vpop.f32.mrb[7].mxu0  ;;  %v3762_v47 = vpack.i.bf16 %v3755_v43, %v3749_v41 }
 0x2ee   : > { %1036 = vrot.lane.b32.xlu0 %v1019_v44, %s3217_s0  ;;  %845 = vrot.lane.b32.xlu1 %v3733_v37, %s3213_s28 }
 0x2f2   : > { %871 = vrot.lane.b32.xlu1 %v3735_v38, %s3214_s17  ;;  %931 = vrot.lane.b32.xlu0 %v914_v48, %s3217_s0 }
 0x2f6   : > { %877 = vrot.lane.b32.xlu1 %v3735_v38, %s3215_s3  ;;  %v905_v38 = vmul.f32 %v3846_v16, %v3725_v33 }
 0x2fa   : > { %855 = vrot.lane.b32.xlu1 %v3725_v33, %s3215_s3 }
 0x2fe   : > { %1058 = vrot.lane.b32.xlu1 %v3727_v34, %s4127_s19 }
 0x302   : > { %953 = vrot.lane.b32.xlu1 %v3725_v33, %s4127_s19 }
 0x306   : > { %1034 = vrot.lane.b32.xlu1 %v1018_v49, %s3217_s0 }
 0x30a   : > { %929 = vrot.lane.b32.xlu1 %v913_v50, %s3217_s0 }
 0x34c   : > { %v3783_v51 = vpop.permute.xlu1 %863  ;;  %v3787_v52 = vpop.permute.xlu0 %843 }
 0x34d   : > { %1062 = vrot.lane.b32.xlu1 %v3783_v51, %s4127_s19  ;;  %v1020_v59 = vsub.f32 0.0, %v3783_v51  ;;  %v915_v62 = vsub.f32 0.0, %v3787_v52 }
 0x350   : > { %v3789_v53 = vpop.permute.xlu1 %869  ;;  %v3797_v55 = vpop.permute.xlu0 %851 }
 0x351   : > { %957 = vrot.lane.b32.xlu1 %v3787_v52, %s4127_s19  ;;  %v1022_v0 = vsub.f32 0.0, %v3789_v53  ;;  %v918_v40 = vsub.f32 0.0, %v3797_v55 }
 0x354   : > { %v3793_v54 = vpop.permute.xlu1 %875  ;;  %v3803_v57 = vpop.permute.xlu0 %857 }
 0x355   : > { %1066 = vrot.lane.b32.xlu1 %v3789_v53, %s4127_s19  ;;  %v1024_v3 = vsub.f32 0.0, %v3793_v54  ;;  %v920_v48 = vsub.f32 0.0, %v3803_v57 }
 0x358   : > { %v3799_v56 = vpop.permute.xlu1 %849  ;;  %v1061_v61 = vpop.permute.xlu0 %1060 }
 0x359   : > { %1070 = vrot.lane.b32.xlu1 %v3793_v54, %s4127_s19  ;;  %v917_v6 = vsub.f32 0.0, %v3799_v56 }
 0x35c   : > { %v3805_v58 = vpop.permute.xlu1 %865  ;;  %v956_v1 = vpop.permute.xlu0 %955 }
 0x35d   : > { %961 = vrot.lane.b32.xlu1 %v3799_v56, %s4127_s19  ;;  %1064 = vrot.lane.b32.xlu0 %v3805_v58, %s4127_s19  ;;  %v1021_v8 = vsub.f32 0.0, %v3805_v58 }
 0x360   : > { %v3812_v60 = vpop.permute.xlu1 %845  ;;  %v1037_v5 = vpop.permute.xlu0 %1036 }
 0x361   : > { %1038 = vrot.lane.b32.xlu1 %v1020_v59, %s3217_s0  ;;  %959 = vrot.lane.b32.xlu0 %v3812_v60, %s4127_s19  ;;  %v916_v10 = vsub.f32 0.0, %v3812_v60  ;;  %v1083_v15 = vsel %vm977_vm2, %v1037_v5, %v1061_v61 }
 0x362   : > { %v1091_v21 = vmul.f32 %v1083_v15, %v3841_v14 }
 0x364   : > { %v3818_v63 = vpop.permute.xlu1 %871  ;;  %v932_v12 = vpop.permute.xlu0 %931  ;;  %v1099_v29 = vadd.f32 %v1091_v21, %v1011_v24  ;;  %v1012_v21 = vmul.f32 %v3846_v16, %v3783_v51  ;;  %v908_v51 = vmul.f32 %v3848_v17, %v3812_v60 }
 0x365   : > { %933 = vrot.lane.b32.xlu1 %v915_v62, %s3217_s0  ;;  %1068 = vrot.lane.b32.xlu0 %v3818_v63, %s4127_s19  ;;  %v1023_v18 = vsub.f32 0.0, %v3818_v63  ;;  %v979_v19 = vsel %vm977_vm2, %v932_v12, %v956_v1  ;;  %v1015_v60 = vmul.f32 %v3848_v17, %v3818_v63 }
 0x366   : > { %v987_v25 = vmul.f32 %v979_v19, %v3841_v14 }
 0x368   : > { %v3824_v2 = vpop.permute.xlu1 %877  ;;  %v995_v36 = vadd.f32 %v987_v25, %v906_v30  ;;  %v907_v25 = vmul.f32 %v3846_v16, %v3787_v52 }
 0x369   : > { %1042 = vrot.lane.b32.xlu1 %v1022_v0, %s3217_s0  ;;  %1072 = vrot.lane.b32.xlu0 %v3824_v2, %s4127_s19  ;;  %v1025_v28 = vsub.f32 0.0, %v3824_v2 }
 0x36a   : > { %v1003_v37 = vmul.f32 0.25, %v995_v36 }
 0x36c   : > { %v3830_v4 = vpop.permute.xlu1 %855 }
 0x36d   : > { %1046 = vrot.lane.b32.xlu1 %v1024_v3, %s3217_s0  ;;  %963 = vrot.lane.b32.xlu0 %v3797_v55, %s4127_s19  ;;  %v919_v11 = vsub.f32 0.0, %v3830_v4 }
 0x370   : > { %v1059_v9 = vpop.permute.xlu1 %1058 }
 0x371   : > { %937 = vrot.lane.b32.xlu1 %v917_v6, %s3217_s0  ;;  %1040 = vrot.lane.b32.xlu0 %v1021_v8, %s3217_s0 }
 0x374   : > { %v954_v13 = vpop.permute.xlu1 %953 }
 0x375   : > { %941 = vrot.lane.b32.xlu1 %v919_v11, %s3217_s0  ;;  %935 = vrot.lane.b32.xlu0 %v916_v10, %s3217_s0 }
 0x378   : > { %v1035_v22 = vpop.permute.xlu1 %1034 }
 0x379   : > { %v1082_v23 = vsel %vm977_vm2, %v1035_v22, %v1059_v9  ;;  %965 = vrot.lane.b32.xlu1 %v3830_v4, %s4127_s19  ;;  %1044 = vrot.lane.b32.xlu0 %v1023_v18, %s3217_s0  ;;  %v1013_v22 = vmul.f32 %v3848_v17, %v3805_v58 }
 0x37a   : > { %v1090_v27 = vmul.f32 %v1082_v23, %v3852_v20 }
 0x37c   : > { %v1098_v31 = vadd.f32 %v1090_v27, %v1010_v26  ;;  %v930_v32 = vpop.permute.xlu1 %929 }
 0x37d   : > { %v978_v35 = vsel %vm977_vm2, %v930_v32, %v954_v13  ;;  %1048 = vrot.lane.b32.xlu0 %v1025_v28, %s3217_s0 }
 0x37e   : > { %v986_v34 = vmul.f32 %v978_v35, %v3852_v20  ;;  %v1117_v39 = vpack.c.bf16 %v1099_v29, %v1098_v31 }
 0x380   : > { %v994_v42 = vadd.f32 %v986_v34, %v905_v38  ;;  %v1126_v44 = vsel %vm1121_vm3, %v1117_v39, 0  ;;  %v1014_v39 = vmul.f32 %v3846_v16, %v3789_v53 }
 0x381   : > { %2378 = vmatpush3.bf16.xpose.msra.mxu0 %v1126_v44  ;;  %939 = vrot.lane.b32.xlu0 %v918_v40, %s3217_s0 }
 0x382   : > { %v1002_v46 = vmul.f32 0.25, %v994_v42  ;;  %2389 = vmatprep.subr.bf16.mxu0 %v3211_v7 }
 0x384   : > { %v1113_v49 = vpack.c.bf16 %v1003_v37, %v1002_v46 }
 0x385   : > { %943 = vrot.lane.b32.xlu0 %v920_v48, %s3217_s0 }
 0x388   : > { %2380 = vmatmul.mubr.msk.bf16.vlgmr.msra.gmra.mrb[8].mxu0 %vm1121_vm3, %v1113_v49 }
 0x389   : > { %967 = vrot.lane.b32.xlu0 %v3803_v57, %s4127_s19  ;;  %2391 = vmatprep.mubr.msk.bf16.mxu0 %vm3212_vm1, %v3211_v7 }
 0x3bf   : > { %v1063_v33 = vpop.permute.xlu1 %1062 }
 0x3c3   : > { %v958_v50 = vpop.permute.xlu1 %957 }
 0x3c7   : > { %v1067_v59 = vpop.permute.xlu1 %1066 }
 0x3cb   : > { %v1071_v61 = vpop.permute.xlu1 %1070 }
 0x3cf   : > { %v962_v62 = vpop.permute.xlu1 %961  ;;  %v1065_v0 = vpop.permute.xlu0 %1064 }
 0x3d3   : > { %v1039_v1 = vpop.permute.xlu1 %1038  ;;  %v960_v3 = vpop.permute.xlu0 %959 }
 0x3d4   : > { %v1084_v11 = vsel %vm977_vm2, %v1039_v1, %v1063_v33  ;;  %v1017_v1 = vmul.f32 %v3848_v17, %v3824_v2  ;;  %v910_v2 = vmul.f32 %v3848_v17, %v3797_v55  ;;  %v911_v55 = vmul.f32 %v3846_v16, %v3830_v4 }
 0x3d5   : > { %v1092_v15 = vmul.f32 %v1084_v11, %v3852_v20 }
 0x3d7   : > { %v934_v5 = vpop.permute.xlu1 %933  ;;  %v1069_v6 = vpop.permute.xlu0 %1068  ;;  %v1100_v26 = vadd.f32 %v1092_v15, %v1012_v21 }
 0x3d8   : > { %v980_v13 = vsel %vm977_vm2, %v934_v5, %v958_v50 }
 0x3d9   : > { %v988_v23 = vmul.f32 %v980_v13, %v3852_v20 }
 0x3db   : > { %v1043_v8 = vpop.permute.xlu1 %1042  ;;  %v1073_v9 = vpop.permute.xlu0 %1072  ;;  %v996_v32 = vadd.f32 %v988_v23, %v907_v25 }
 0x3dc   : > { %v1086_v30 = vsel %vm977_vm2, %v1043_v8, %v1067_v59 }
 0x3dd   : > { %v1094_v36 = vmul.f32 %v1086_v30, %v3852_v20  ;;  %v1004_v44 = vmul.f32 0.25, %v996_v32 }
 0x3df   : > { %v964_v10 = vpop.permute.xlu0 %963  ;;  %v1047_v12 = vpop.permute.xlu1 %1046  ;;  %v1102_v33 = vadd.f32 %v1094_v36, %v1014_v39 }
 0x3e0   : > { %v1088_v40 = vsel %vm977_vm2, %v1047_v12, %v1071_v61 }
 0x3e1   : > { %v1096_v53 = vmul.f32 %v1088_v40, %v3852_v20 }
 0x3e3   : > { %v1041_v18 = vpop.permute.xlu0 %1040  ;;  %v938_v27 = vpop.permute.xlu1 %937 }
 0x3e4   : > { %v1085_v19 = vsel %vm977_vm2, %v1041_v18, %v1065_v0  ;;  %v982_v49 = vsel %vm977_vm2, %v938_v27, %v962_v62  ;;  %v1016_v0 = vmul.f32 %v3846_v16, %v3793_v54  ;;  %v909_v62 = vmul.f32 %v3846_v16, %v3799_v56 }
 0x3e5   : > { %v1093_v24 = vmul.f32 %v1085_v19, %v3841_v14 }
 0x3e6   : > { %v1104_v8 = vadd.f32 %v1096_v53, %v1016_v0 }
 0x3e7   : > { %v1101_v28 = vadd.f32 %v1093_v24, %v1013_v22  ;;  %v936_v29 = vpop.permute.xlu0 %935  ;;  %v942_v37 = vpop.permute.xlu1 %941 }
 0x3e8   : > { %v981_v31 = vsel %vm977_vm2, %v936_v29, %v960_v3  ;;  %v990_v3 = vmul.f32 %v982_v49, %v3852_v20  ;;  %v912_v29 = vmul.f32 %v3848_v17, %v3803_v57  ;;  %v1106_v57 = vlaneseq }
 0x3e9   : > { %v989_v58 = vmul.f32 %v981_v31, %v3841_v14  ;;  %v1118_v35 = vpack.c.bf16 %v1101_v28, %v1100_v26 }
 0x3ea   : > { %v998_v15 = vadd.f32 %v990_v3, %v909_v62  ;;  %v1110_v17 = vand.u32 127, %v1106_v57 }
 0x3eb   : > { %v997_v38 = vadd.f32 %v989_v58, %v908_v51  ;;  %v1045_v34 = vpop.permute.xlu0 %1044  ;;  %v1173_v52 = vsel %vm1121_vm3, %v1118_v35, 0  ;;  %v966_v11 = vpop.permute.xlu1 %965 }
 0x3ec   : > { %v1087_v42 = vsel %vm977_vm2, %v1045_v34, %v1069_v6  ;;  %2384 = vmatpush3.bf16.xpose.msra.mxu1 %v1173_v52  ;;  %v984_v19 = vsel %vm977_vm2, %v942_v37, %v966_v11 }
 0x3ed   : > { %v1005_v46 = vmul.f32 0.25, %v997_v38  ;;  %v1095_v48 = vmul.f32 %v1087_v42, %v3841_v14  ;;  %2395 = vmatprep.subr.bf16.mxu1 %v3211_v7  ;;  %v992_v24 = vmul.f32 %v984_v19, %v3852_v20 }
 0x3ef   : > { %v1114_v50 = vpack.c.bf16 %v1005_v46, %v1004_v44  ;;  %v1103_v59 = vadd.f32 %v1095_v48, %v1015_v60  ;;  %v1049_v61 = vpop.permute.xlu0 %1048  ;;  %v1000_v30 = vadd.f32 %v992_v24, %v911_v55 }
 0x3f0   : > { %v1089_v63 = vsel %vm977_vm2, %v1049_v61, %v1073_v9 }
 0x3f1   : > { %v1097_v5 = vmul.f32 %v1089_v63, %v3841_v14  ;;  %v1119_v6 = vpack.c.bf16 %v1103_v59, %v1102_v33  ;;  %v1008_v16 = vmul.f32 0.25, %v1000_v30 }
 0x3f3   : > { %v1105_v12 = vadd.f32 %v1097_v5, %v1017_v1  ;;  %2386 = vmatmul.mubr.msk.bf16.vlgmr.msra.gmra.mrb[4].mxu1 %vm1121_vm3, %v1114_v50  ;;  %v940_v13 = vpop.permute.xlu0 %939  ;;  %v1220_v54 = vsel %vm1121_vm3, %v1119_v6, 0 }
 0x3f4   : > { %v983_v9 = vsel %vm977_vm2, %v940_v13, %v964_v10  ;;  %2390 = vmatpush3.bf16.xpose.msra.mxu0 %v1220_v54  ;;  %2397 = vmatprep.mubr.msk.bf16.mxu1 %vm3212_vm1, %v3211_v7  ;;  %v1006_v10 = vmul.f32 0.25, %v998_v15 }
 0x3f5   : > { %v991_v56 = vmul.f32 %v983_v9, %v3841_v14  ;;  %v1120_v18 = vpack.c.bf16 %v1105_v12, %v1104_v8  ;;  %2401 = vmatprep.subr.bf16.mxu0 %v3211_v7 }
 0x3f7   : > { %v999_v21 = vadd.f32 %v991_v56, %v910_v2  ;;  %v944_v22 = vpop.permute.xlu0 %943  ;;  %v1267_v23 = vsel %vm1121_vm3, %v1120_v18, 0 }
 0x3f8   : > { %2396 = vmatpush3.bf16.xpose.msra.mxu1 %v1267_v23 }
 0x3f9   : > { %v1007_v25 = vmul.f32 0.25, %v999_v21  ;;  %2407 = vmatprep.subr.bf16.mxu1 %v3211_v7 }
 0x3fb   : > { %v1115_v26 = vpack.c.bf16 %v1007_v25, %v1006_v10  ;;  %v968_v27 = vpop.permute.xlu0 %967 }
 0x3fc   : > { %v985_v28 = vsel %vm977_vm2, %v944_v22, %v968_v27 }
 0x3fd   : > { %v993_v31 = vmul.f32 %v985_v28, %v3841_v14  ;;  %2392 = vmatmul.mubr.msk.bf16.vlgmr.msra.gmra.mrb[12].mxu0 %vm1121_vm3, %v1115_v26  ;;  %v1107_v14 = vshrl.u32 %v1106_v57, 7 }
 0x3fe   : > { %2402 = vmatpush3.bf16.msra.mxu0 %v1414_v45  ;;  %2403 = vmatprep.mubr.msk.bf16.mxu0 %vm3212_vm1, %v3211_v7 }
 0x3ff   : > { %v1001_v4 = vadd.f32 %v993_v31, %v912_v29  ;;  %2413 = vmatprep.subr.bf16.mxu0 %v3211_v7  ;;  %v1108_v32 = vadd.s32 8, %v1107_v14  ;;  %vm1111_vm4 = vcmp.le.s32.totalorder %v1110_v17, %v1107_v14 }
 0x401   : > { %v1009_v20 = vmul.f32 0.25, %v1001_v4  ;;  %vm1112_vm5 = vcmp.le.s32.totalorder %v1110_v17, %v1108_v32 }
 0x403   : > { %v1116_v51 = vpack.c.bf16 %v1009_v20, %v1008_v16 }
 0x405   : > { %2398 = vmatmul.mubr.msk.bf16.vlgmr.msra.gmra.mrb[8].mxu1 %vm1121_vm3, %v1116_v51 }
 0x406   : > { %2409 = vmatprep.mubr.msk.bf16.mxu1 %vm3212_vm1, %v3211_v7 }
 0x45b   : > { %v1162_v41 = vpop.f32.mrb[8].mxu0 }
 0x45c   : > { %v1314_v43 = vsel %vm1111_vm4, %v1162_v41, -1e+30  ;;  %v2381_v45 = vpop.f32.mrb[9].mxu0 }
 0x45d   : > { %v1165_v58 = vpop.f32.mrb[10].mxu0  ;;  %v1322_v35 = vsel %vm1121_vm3, %v1314_v43, -inf }
 0x45e   : > { %v1315_v36 = vsel %vm1112_vm5, %v1165_v58, -1e+30  ;;  %1323 = vmax.xlane.f32.xlu1 %v1322_v35  ;;  %v2382_v38 = vpop.f32.mrb[11].mxu0 }
 0x45f   : > { %v1325_v34 = vsel %vm1121_vm3, %v1315_v36, -inf }
 0x460   : > { %1326 = vmax.xlane.f32.xlu0 %v1325_v34 }
 0x4c6   : > { %v1209_v52 = vpop.f32.mrb[4].mxu1 }
 0x4c7   : > { %v1316_v39 = vsel %vm1111_vm4, %v1209_v52, -1e+30  ;;  %v2387_v40 = vpop.f32.mrb[5].mxu1 }
 0x4c8   : > { %v1212_v42 = vpop.f32.mrb[6].mxu1  ;;  %v1328_v60 = vsel %vm1121_vm3, %v1316_v39, -inf }
 0x4c9   : > { %v1317_v44 = vsel %vm1112_vm5, %v1212_v42, -1e+30  ;;  %v2388_v37 = vpop.f32.mrb[7].mxu1  ;;  %1329 = vmax.xlane.f32.xlu0 %v1328_v60 }
 0x4ca   : > { %v1331_v46 = vsel %vm1121_vm3, %v1317_v44, -inf }
 0x4cb   : > { %1332 = vmax.xlane.f32.xlu1 %v1331_v46 }
 0x4d0   : > { %v1256_v48 = vpop.f32.mrb[12].mxu0 }
 0x4d1   : > { %v1318_v49 = vsel %vm1111_vm4, %v1256_v48, -1e+30  ;;  %v2393_v33 = vpop.f32.mrb[13].mxu0 }
 0x4d2   : > { %v1259_v53 = vpop.f32.mrb[14].mxu0  ;;  %v1334_v50 = vsel %vm1121_vm3, %v1318_v49, -inf }
 0x4d3   : > { %v1319_v59 = vsel %vm1112_vm5, %v1259_v53, -1e+30  ;;  %1335 = vmax.xlane.f32.xlu0 %v1334_v50  ;;  %v2394_v61 = vpop.f32.mrb[15].mxu0 }
 0x4d4   : > { %v1337_v0 = vsel %vm1121_vm3, %v1319_v59, -inf }
 0x4d5   : > { %1338 = vmax.xlane.f32.xlu1 %v1337_v0 }
 0x4d8   : > { %v1303_v63 = vpop.f32.mrb[8].mxu1 }
 0x4d9   : > { %v1320_v1 = vsel %vm1111_vm4, %v1303_v63, -1e+30  ;;  %v2399_v3 = vpop.f32.mrb[9].mxu1 }
 0x4da   : > { %v1306_v5 = vpop.f32.mrb[10].mxu1  ;;  %v1340_v6 = vsel %vm1121_vm3, %v1320_v1, -inf }
 0x4db   : > { %v3966_v62 = vsel %vm1112_vm5, %v1306_v5, -1e+30  ;;  %v2400_v8 = vpop.f32.mrb[11].mxu1  ;;  %1341 = vmax.xlane.f32.xlu0 %v1340_v6 }
 0x4dc   : > { %v1343_v11 = vsel %vm1121_vm3, %v3966_v62, -inf }
 0x4dd   : > { %1344 = vmax.xlane.f32.xlu1 %v1343_v11 }
 0x4eb   : > { %v1324_v12 = vpop.xlane.xlu1 %1323 }
 0x4ec   : > { %v1346_v13 = vsub.f32 %v1314_v43, %v1324_v12 }
 0x4ed   : > { %v1327_v54 = vpop.xlane.xlu0 %1326 }
 0x4ee   : > { %v1354_v9 = vmul.f32 1.442695, %v1346_v13  ;;  %v1347_v2 = vsub.f32 %v1315_v36, %v1327_v54 }
 0x4f0   : > { %2719 = vpow2.f32 %v1354_v9  ;;  %v1356_v15 = vmul.f32 1.442695, %v1347_v2 }
 0x4f2   : > { %2721 = vpow2.f32 %v1356_v15 }
 0x4fa   : > { %v2720_v56 = vpop.eup %2719 }
 0x4fb   : > { %v1370_v18 = vsel %vm1121_vm3, %v2720_v56, 0.0 }
 0x4fc   : > { %v2722_v19 = vpop.eup %2721  ;;  %1371 = vadd.xlane.f32.xlu0 %v1370_v18 }
 0x4fd   : > { %v1373_v21 = vsel %vm1121_vm3, %v2722_v19, 0.0 }
 0x4fe   : > { %1374 = vadd.xlane.f32.xlu1 %v1373_v21 }
 0x556   : > { %v1330_v22 = vpop.xlane.xlu0 %1329 }
 0x557   : > { %v1348_v23 = vsub.f32 %v1316_v39, %v1330_v22 }
 0x558   : > { %v1333_v10 = vpop.xlane.xlu1 %1332 }
 0x559   : > { %v1358_v24 = vmul.f32 1.442695, %v1348_v23  ;;  %v1349_v25 = vsub.f32 %v1317_v44, %v1333_v10 }
 0x55b   : > { %2723 = vpow2.f32 %v1358_v24  ;;  %v1360_v55 = vmul.f32 1.442695, %v1349_v25 }
 0x55d   : > { %2725 = vpow2.f32 %v1360_v55 }
 0x560   : > { %v1336_v26 = vpop.xlane.xlu0 %1335 }
 0x561   : > { %v1350_v27 = vsub.f32 %v1318_v49, %v1336_v26 }
 0x562   : > { %v1339_v28 = vpop.xlane.xlu1 %1338 }
 0x563   : > { %v1362_v29 = vmul.f32 1.442695, %v1350_v27  ;;  %v1351_v30 = vsub.f32 %v1319_v59, %v1339_v28 }
 0x565   : > { %v3972_v31 = vpop.eup %2723  ;;  %2727 = vpow2.f32 %v1362_v29  ;;  %v1364_v4 = vmul.f32 1.442695, %v1351_v30 }
 0x566   : > { %v1376_v16 = vsel %vm1121_vm3, %v3972_v31, 0.0 }
 0x567   : > { %v2726_v20 = vpop.eup %2725  ;;  %2729 = vpow2.f32 %v1364_v4  ;;  %1377 = vadd.xlane.f32.xlu0 %v1376_v16  ;;  %v2696_v4 = vld [vmem:[#allocation13 + $0x8] sm:$0xff]  }
 0x568   : > { %v1342_v51 = vpop.xlane.xlu0 %1341  ;;  %v1379_v57 = vsel %vm1121_vm3, %v2726_v20, 0.0 }
 0x569   : > { %v1352_v14 = vsub.f32 %v1320_v1, %v1342_v51  ;;  %1380 = vadd.xlane.f32.xlu1 %v1379_v57 }
 0x56a   : > { %v1345_v36 = vpop.xlane.xlu1 %1344 }
 0x56b   : > { %v1366_v17 = vmul.f32 1.442695, %v1352_v14  ;;  %v1353_v52 = vsub.f32 %v3966_v62, %v1345_v36  ;;  %v2697_v14 = vld [vmem:[#allocation13 + $0x10] sm:$0xff]  }
 0x56d   : > { %2731 = vpow2.f32 %v1366_v17  ;;  %v1368_v42 = vmul.f32 1.442695, %v1353_v52 }
 0x56f   : > { %v2728_v32 = vpop.eup %2727 }
 0x570   : > { %v1382_v41 = vsel %vm1121_vm3, %v2728_v32, 0.0 }
 0x571   : > { %v2730_v43 = vpop.eup %2729  ;;  %1383 = vadd.xlane.f32.xlu0 %v1382_v41 }
 0x572   : > { %v1385_v45 = vsel %vm1121_vm3, %v2730_v43, 0.0 }
 0x573   : > { %1386 = vadd.xlane.f32.xlu1 %v1385_v45 }
 0x577   : > { %v3979_v58 = vpop.eup %2731 }
 0x578   : > { %v1388_v35 = vsel %vm1121_vm3, %v3979_v58, 0.0 }
 0x579   : > { %1389 = vadd.xlane.f32.xlu0 %v1388_v35  ;;  %v2698_v35 = vld [vmem:[#allocation13 + $0x18] sm:$0xff]  }
 0x584   : > { %2659 = vrot.lane.b32.xlu1 %v3762_v47, %s3214_s17 }
 0x589   : > { %v1372_v38 = vpop.xlane.xlu0 %1371 }
 0x58a   : > { %2733 = vrcp.f32 %v1372_v38 }
 0x58b   : > { %v1375_v34 = vpop.xlane.xlu1 %1374 }
 0x58c   : > { %2735 = vrcp.f32 %v1375_v34 }
 0x58d   : > { %2737 = vpow2.f32 %v1368_v42 }
 0x58f   : > { %2654 = vrot.lane.b32.xlu0 %v3762_v47, %s3213_s28  ;;  %s2285_s28 = sshll.u32 %s3309_s27, 8  ;;  %s2007_s27 = scalar_lea.sflag [#allocation4], %s3658_s1 }
 0x594   : > { %v2734_v39 = vpop.eup %2733 }
 0x595   : > { %v1402_v60 = vmul.f32 %v2734_v39, %v2720_v56 }
 0x596   : > { %v2736_v40 = vpop.eup %2735 }
 0x597   : > { %v1403_v44 = vmul.f32 %v2736_v40, %v2722_v19  ;;  %v2738_v46 = vpop.eup %2737 }
 0x598   : > { %v1391_v48 = vsel %vm1121_vm3, %v2738_v46, 0.0 }
 0x599   : > { %v1410_v37 = vpack.c.bf16 %v1403_v44, %v1402_v60 }
 0x59b   : > { %2404 = vmatmul.mubr.msk.bf16.vlgmr.msra.gmra.mrb[16].mxu0 %vm1121_vm3, %v1410_v37 }
 0x59c   : > { %2415 = vmatprep.mubr.msk.bf16.mxu0 %vm3212_vm1, %v3211_v7 }
 0x5a8   : > { %1392 = vadd.xlane.f32.xlu1 %v1391_v48 }
 0x5b9   : > { %2664 = vrot.lane.b32.xlu1 %v3762_v47, %s3215_s3  ;;  %s4160_s3 = sld [smem:[#allocation35_spill]] }
 0x5bf   : > { %s4060_s0 = scalar_lea.hbm %s4160_s3, %s2285_s28 }
 0x5f4   : > { %v1378_v49 = vpop.xlane.xlu0 %1377 }
 0x5f6   : > { %v1381_v33 = vpop.xlane.xlu1 %1380 }
 0x5f7   : > { %2739 = vrcp.f32 %v1381_v33 }
 0x5fe   : > { %v1384_v53 = vpop.xlane.xlu0 %1383 }
 0x5ff   : > { %2741 = vrcp.f32 %v1384_v53 }
 0x600   : > { %2743 = vrcp.f32 %v1378_v49  ;;  %v1387_v50 = vpop.xlane.xlu1 %1386 }
 0x601   : > { %2745 = vrcp.f32 %v1387_v50  ;;  %v2740_v3 = vpop.eup %2739 }
 0x602   : > { %v1405_v12 = vmul.f32 %v2740_v3, %v2726_v20 }
 0x604   : > { %v2660_v59 = vpop.permute.xlu1 %2659 }
 0x605   : > { %v2662_v61 = vunpack.i.h.bf16 %v2660_v59  ;;  %v2661_v0 = vunpack.i.l.bf16 %v2660_v59 }
 0x606   : > { %v1390_v63 = vpop.xlane.xlu0 %1389 }
 0x607   : > { %v1416_v1 = vpack.c.bf16 %v2662_v61, %v2661_v0  ;;  %2747 = vrcp.f32 %v1390_v63 }
 0x609   : > { %v2742_v5 = vpop.eup %2741  ;;  %2414 = vmatpush3.bf16.msra.mxu0 %v1416_v1 }
 0x60a   : > { %v2744_v6 = vpop.eup %2743  ;;  %v2655_v62 = vpop.permute.xlu0 %2654  ;;  %2425 = vmatprep.subr.bf16.mxu0 %v3211_v7  ;;  %v1406_v13 = vmul.f32 %v2742_v5, %v2728_v32  ;;  %v2763_v5 = vld [vmem:[%s3664_s13] sm:$0xff] }
 0x60b   : > { %v2746_v47 = vpop.eup %2745  ;;  %v2657_v8 = vunpack.i.h.bf16 %v2655_v62  ;;  %v2656_v11 = vunpack.i.l.bf16 %v2655_v62  ;;  %v1404_v2 = vmul.f32 %v2744_v6, %v3972_v31  ;;  %v2695_v31 = vld [vmem:[#allocation13] sm:$0xff]  }
 0x60c   : > { %v1407_v54 = vmul.f32 %v2746_v47, %v2730_v43 }
 0x60d   : > { %v1415_v9 = vpack.c.bf16 %v2657_v8, %v2656_v11  ;;  %v1411_v56 = vpack.c.bf16 %v1405_v12, %v1404_v2  ;;  %v2764_v8 = vld [vmem:[%s3664_s13 + $0x8] sm:$0xff]  ;;  %s2020_s13 = sshll.u32 %s587_s20, 4  ;;  %s4053_s13 = int_to_ptr.vmem [resolvable:$true] %s2020_s13 }
 0x60e   : > { %v1412_v15 = vpack.c.bf16 %v1407_v54, %v1406_v13 }
 0x60f   : > { %2408 = vmatpush3.bf16.msra.mxu1 %v1415_v9 }
 0x610   : > { %2416 = vmatmul.mubr.msk.bf16.vlgmr.msra.gmra.mrb[20].mxu0 %vm1121_vm3, %v1412_v15  ;;  %2419 = vmatprep.subr.bf16.mxu1 %v3211_v7  ;;  %v2699_v15 = vld [vmem:[#allocation14] sm:$0xff]  }
 0x611   : > { %2433 = vmatprep.mubr.msk.bf16.mxu0 %vm3212_vm1, %v3211_v7  ;;  %v2748_v10 = vpop.eup %2747  ;;  %2426 = vmatpush3.bf16.msra.mxu0 %v2695_v31 }
 0x612   : > { %2410 = vmatmul.mubr.msk.bf16.vlgmr.msra.gmra.mrb[12].mxu1 %vm1121_vm3, %v1411_v56  ;;  %v1408_v25 = vmul.f32 %v2748_v10, %v3979_v58  ;;  %2427 = vmatprep.subr.bf16.mxu0 %v3211_v7  ;;  %v2700_v56 = vld [vmem:[#allocation17] sm:$0xff]   ;;  %v2706_v10 = vld [vmem:[#allocation17 + $0x18] sm:$0xff]  }
 0x613   : > { %2421 = vmatprep.mubr.msk.bf16.mxu1 %vm3212_vm1, %v3211_v7 }
 0x615   : > { %2428 = vmatpush3.bf16.msra.mxu0 %v2696_v4  ;;  %v2258_v4 = vld [vmem:[#allocation7] ss:$0 sm:$0xff] }
 0x616   : > { %2429 = vmatprep.subr.bf16.mxu0 %v3211_v7 }
 0x619   : > { %2430 = vmatpush3.bf16.msra.mxu0 %v2697_v14  ;;  %v2707_v14 = vld [vmem:[#allocation16] sm:$0xff]  }
 0x61a   : > { %2431 = vmatprep.subr.bf16.mxu0 %v3211_v7 }
 0x61d   : > { %2432 = vmatpush3.bf16.msra.mxu0 %v2698_v35  ;;  %v2714_v35 = vld [vmem:[#allocation16 + $0x38] sm:$0xff]  }
 0x61e   : > { %2449 = vmatprep.subr.bf16.mxu0 %v3211_v7 }
 0x635   : > { %v1393_v18 = vpop.xlane.xlu1 %1392 }
 0x636   : > { %2749 = vrcp.f32 %v1393_v18  ;;  %v2701_v18 = vld [vmem:[#allocation14 + $0x8] sm:$0xff]  }
 0x639   : > { %v2665_v19 = vpop.permute.xlu1 %2664 }
 0x63a   : > { %v2667_v21 = vunpack.i.h.bf16 %v2665_v19  ;;  %v2666_v22 = vunpack.i.l.bf16 %v2665_v19  ;;  %v2702_v19 = vld [vmem:[#allocation17 + $0x8] sm:$0xff]  }
 0x63c   : > { %v1417_v23 = vpack.c.bf16 %v2667_v21, %v2666_v22  ;;  %v2703_v21 = vld [vmem:[#allocation14 + $0x10] sm:$0xff]  }
 0x63d   : > { %v2704_v22 = vld [vmem:[#allocation17 + $0x10] sm:$0xff]  }
 0x63e   : > { %2420 = vmatpush3.bf16.msra.mxu1 %v1417_v23  ;;  %v2705_v23 = vld [vmem:[#allocation14 + $0x18] sm:$0xff]  }
 0x63f   : > { %2437 = vmatprep.subr.bf16.mxu1 %v3211_v7 }
 0x640   : > { %v2750_v24 = vpop.eup %2749 }
 0x641   : > { %v1409_v55 = vmul.f32 %v2750_v24, %v2738_v46 }
 0x643   : > { %v1413_v26 = vpack.c.bf16 %v1409_v55, %v1408_v25 }
 0x645   : > { %2422 = vmatmul.mubr.msk.bf16.vlgmr.msra.gmra.mrb[16].mxu1 %vm1121_vm3, %v1413_v26 }
 0x646   : > { %2445 = vmatprep.mubr.msk.bf16.mxu1 %vm3212_vm1, %v3211_v7  ;;  %2438 = vmatpush3.bf16.msra.mxu1 %v2699_v15 }
 0x647   : > { %2439 = vmatprep.subr.bf16.mxu1 %v3211_v7 }
 0x64a   : > { %2440 = vmatpush3.bf16.msra.mxu1 %v2701_v18 }
 0x64b   : > { %2441 = vmatprep.subr.bf16.mxu1 %v3211_v7 }
 0x64e   : > { %2442 = vmatpush3.bf16.msra.mxu1 %v2703_v21 }
 0x64f   : > { %2443 = vmatprep.subr.bf16.mxu1 %v3211_v7 }
 0x652   : > { %2444 = vmatpush3.bf16.msra.mxu1 %v2705_v23 }
 0x653   : > { %2461 = vmatprep.subr.bf16.mxu1 %v3211_v7 }
 0x66e   : > { %v1455_v27 = vpop.f32.mrb[16].mxu0 }
 0x66f   : > { %v2405_v28 = vpop.f32.mrb[17].mxu0 }
 0x670   : > { %v1458_v29 = vpop.f32.mrb[18].mxu0 }
 0x671   : > { %v2406_v30 = vpop.f32.mrb[19].mxu0 }
 0x6e3   : > { %v1543_v16 = vpop.f32.mrb[20].mxu0 }
 0x6e4   : > { %v2417_v20 = vpop.f32.mrb[21].mxu0 }
 0x6e5   : > { %v1499_v51 = vpop.f32.mrb[12].mxu1  ;;  %v1546_v57 = vpop.f32.mrb[22].mxu0 }
 0x6e6   : > { %v2673_v17 = vpack.i.bf16 %v1546_v57, %v1543_v16  ;;  %v2411_v32 = vpop.f32.mrb[13].mxu1  ;;  %v2418_v41 = vpop.f32.mrb[23].mxu0 }
 0x6e7   : > { %v1502_v43 = vpop.f32.mrb[14].mxu1  ;;  %v2709_v32 = vld [vmem:[#allocation16 + $0x10] sm:$0xff]   ;;  %v2710_v41 = vld [vmem:[#allocation16 + $0x18] sm:$0xff]  }
 0x6e8   : > { %v2668_v45 = vpack.i.bf16 %v1502_v43, %v1499_v51  ;;  %v2412_v58 = vpop.f32.mrb[15].mxu1  ;;  %2674 = vrot.lane.b32.xlu1 %v2673_v17, %s3218_s16  ;;  %v2708_v17 = vld [vmem:[#allocation16 + $0x8] sm:$0xff]   ;;  %v2711_v43 = vld [vmem:[#allocation16 + $0x20] sm:$0xff]   ;;  %s3103_s16 = scalar_lea.vmem %s4053_s13, 256 }
 0x6e9   : > { %v2713_v58 = vld [vmem:[#allocation16 + $0x30] sm:$0xff]   ;;  %p3104_p2 = scmp.ne.s32.totalorder %s4053_s13, %s3103_s16 }
 0x6ea   : > { %2669 = vrot.lane.b32.xlu0 %v2668_v45, %s3219_s14  ;;  %v2712_v45 = vld [vmem:[#allocation16 + $0x28] sm:$0xff]   ;;  %s3221_s14 = smov [#allocation22]  }
 0x6eb   : > { %p3105_p6 = pnand %p3104_p2, %p4161_p8 }
 0x6ed   : > { %p3106_p11 = pneg %p3105_p6 }
 0x718   : > { %v1587_v36 = vpop.f32.mrb[16].mxu1 }
 0x719   : > { %v2423_v38 = vpop.f32.mrb[17].mxu1 }
 0x71a   : > { %v1590_v34 = vpop.f32.mrb[18].mxu1 }
 0x71b   : > { %v2678_v52 = vpack.i.bf16 %v1590_v34, %v1587_v36  ;;  %v2424_v39 = vpop.f32.mrb[19].mxu1 }
 0x71d   : > { %2679 = vrot.lane.b32.xlu0 %v2678_v52, %s3220_s18  ;;  %s3107_s18 = sshll.u32 %s3221_s14, 4  ;;  %s3108_s18 = int_to_ptr.vmem [resolvable:$false] %s3107_s18 }
 0x71e   : > { %s3109_s19 = scalar_lea.vmem %s3108_s18, 512  ;;  %p3110_p12 = scmp.lt.s32.totalorder %s4053_s13, %s3108_s18 }
 0x71f   : > { %p3111_p3 = scmp.lt.s32.totalorder %s3109_s19, %s3103_s16 }
 0x721   : > { %p3112_p5 = por %p3111_p3, %p3110_p12 }
 0x723   : > { %p3113_p9 = pnand %p3112_p5, %p3106_p11 }
 0x75a   : > { %v2675_v44 = vpop.permute.xlu1 %2674 }
 0x75b   : > { %v2677_v48 = vunpack.i.h.bf16 %v2675_v44  ;;  %v2676_v49 = vunpack.i.l.bf16 %v2675_v44 }
 0x75c   : > { %v2670_v40 = vpop.permute.xlu0 %2669 }
 0x75d   : > { %v2672_v42 = vunpack.i.h.bf16 %v2670_v40  ;;  %v2671_v60 = vunpack.i.l.bf16 %v2670_v40 }
 0x75f   : > { %v1618_v37 = vsel %vm1121_vm3, %v1455_v27, %v2671_v60  ;;  %v1619_v46 = vsel %vm1121_vm3, %v1458_v29, %v2672_v42 }
 0x760   : > { %v1621_v59 = vsel %vm1620_vm6, %v1618_v37, %v2676_v49  ;;  %v1622_v61 = vsel %vm1620_vm6, %v1619_v46, %v2677_v48 }
 0x78f   : > { %v2680_v33 = vpop.permute.xlu0 %2679 }
 0x790   : > { %v2682_v53 = vunpack.i.h.bf16 %v2680_v33  ;;  %v2681_v50 = vunpack.i.l.bf16 %v2680_v33 }
 0x792   : > { %v1624_v0 = vsel %vm1623_vm7, %v1621_v59, %v2681_v50  ;;  %v1625_v63 = vsel %vm1623_vm7, %v1622_v61, %v2682_v53 }
 0x793   : > { %v1626_v1 = vpack.c.bf16 %v1625_v63, %v1624_v0 }
 0x795   : > { %2434 = vmatmul.mubr.msk.bf16.vlgmr.msra.gmra.mrb[24].mxu0 %vm593_vm0, %v1626_v1 }
 0x796   : > { %2457 = vmatprep.mubr.msk.bf16.mxu0 %vm3212_vm1, %v3211_v7  ;;  %2450 = vmatpush3.bf16.msra.mxu0 %v2700_v56 }
 0x797   : > { %2451 = vmatprep.subr.bf16.mxu0 %v3211_v7 }
 0x79a   : > { %2452 = vmatpush3.bf16.msra.mxu0 %v2702_v19 }
 0x79b   : > { %2453 = vmatprep.subr.bf16.mxu0 %v3211_v7 }
 0x79e   : > { %2454 = vmatpush3.bf16.msra.mxu0 %v2704_v22 }
 0x79f   : > { %2455 = vmatprep.subr.bf16.mxu0 %v3211_v7 }
 0x7a2   : > { %2456 = vmatpush3.bf16.msra.mxu0 %v2706_v10 }
 0x868   : > { %v1696_v3 = vpop.f32.mrb[24].mxu0 }
 0x869   : > { %v4018_v6 = vadd.f32 %v2763_v5, %v1696_v3  ;;  %v2435_v62 = vpop.f32.mrb[25].mxu0 }
 0x86a   : > { %v1699_v47 = vpop.f32.mrb[26].mxu0 }
 0x86b   : > { %v4021_v11 = vadd.f32 %v2764_v8, %v1699_v47  ;;  %v2436_v12 = vpop.f32.mrb[27].mxu0  ;;  %v1705_v13 = vmul.f32 %v4018_v6, %v4018_v6 }
 0x86d   : > { %v1707_v54 = vsel %vm593_vm0, %v1705_v13, 0.0  ;;  %v1706_v9 = vmul.f32 %v4021_v11, %v4021_v11 }
 0x86e   : > { %1708 = vadd.xlane.f32.xlu1 %v1707_v54 }
 0x86f   : > { %v1710_v2 = vsel %vm593_vm0, %v1706_v9, 0.0 }
 0x870   : > { %1711 = vadd.xlane.f32.xlu0 %v1710_v2 }
 0x8fb   : > { %v1709_v24 = vpop.xlane.xlu1 %1708 }
 0x8fc   : > { %v1713_v25 = vmul.f32 0.015625, %v1709_v24 }
 0x8fd   : > { %v1712_v55 = vpop.xlane.xlu0 %1711 }
 0x8fe   : > { %v1715_v26 = vadd.f32 1e-05, %v1713_v25  ;;  %v1714_v27 = vmul.f32 0.015625, %v1712_v55 }
 0x900   : > { %2751 = vrsqrt.f32 %v1715_v26  ;;  %v1716_v28 = vadd.f32 1e-05, %v1714_v27 }
 0x902   : > { %2753 = vrsqrt.f32 %v1716_v28 }
 0x90a   : > { %v2752_v29 = vpop.eup %2751 }
 0x90b   : > { %v1719_v30 = vmul.f32 %v2752_v29, %v4018_v6 }
 0x90c   : > { %v2754_v31 = vpop.eup %2753 }
 0x90d   : > { %v1720_v16 = vmul.f32 %v2754_v31, %v4021_v11  ;;  %v1728_v20 = vmul.f32 %v2258_v4, %v1719_v30 }
 0x90f   : > { %v1729_v51 = vmul.f32 %v2258_v4, %v1720_v16 }
 0x911   : > { %v1730_v57 = vpack.c.bf16 %v1729_v51, %v1728_v20 }
 0x913   : > { %2446 = vmatmul.mubr.msk.bf16.vlgmr.msra.gmra.mrb[20].mxu1 %vm593_vm0, %v1730_v57  ;;  %2458 = vmatmul.mubr.msk.bf16.vlgmr.msra.gmra.mrb[28].mxu0 %vm593_vm0, %v1730_v57 }
 0x914   : > { %2477 = vmatprep.mubr.msk.bf16.mxu1 %vm3212_vm1, %v3211_v7  ;;  %2462 = vmatpush3.bf16.msra.mxu1 %v2707_v14 }
 0x915   : > { %2463 = vmatprep.subr.bf16.mxu1 %v3211_v7 }
 0x918   : > { %2464 = vmatpush3.bf16.msra.mxu1 %v2708_v17 }
 0x919   : > { %2465 = vmatprep.subr.bf16.mxu1 %v3211_v7 }
 0x91c   : > { %2466 = vmatpush3.bf16.msra.mxu1 %v2709_v32 }
 0x91d   : > { %2467 = vmatprep.subr.bf16.mxu1 %v3211_v7 }
 0x920   : > { %2468 = vmatpush3.bf16.msra.mxu1 %v2710_v41 }
 0x921   : > { %2469 = vmatprep.subr.bf16.mxu1 %v3211_v7 }
 0x924   : > { %2470 = vmatpush3.bf16.msra.mxu1 %v2711_v43 }
 0x925   : > { %2471 = vmatprep.subr.bf16.mxu1 %v3211_v7 }
 0x928   : > { %2472 = vmatpush3.bf16.msra.mxu1 %v2712_v45 }
 0x929   : > { %2473 = vmatprep.subr.bf16.mxu1 %v3211_v7 }
 0x92c   : > { %2474 = vmatpush3.bf16.msra.mxu1 %v2713_v58 }
 0x92d   : > { %2475 = vmatprep.subr.bf16.mxu1 %v3211_v7 }
 0x930   : > { %2476 = vmatpush3.bf16.msra.mxu1 %v2714_v35 }
 0x9e6   : > { %v1800_v36 = vpop.f32.mrb[20].mxu1  ;;  %v1873_v38 = vpop.f32.mrb[28].mxu0 }
 0x9e7   : > { %v2269_v34 = vmul.f32 -1.442695, %v1800_v36  ;;  %v2447_v52 = vpop.f32.mrb[21].mxu1  ;;  %v2459_v39 = vpop.f32.mrb[29].mxu0 }
 0x9e8   : > { %v1803_v40 = vpop.f32.mrb[22].mxu1  ;;  %v1876_v42 = vpop.f32.mrb[30].mxu0 }
 0x9e9   : > { %2755 = vpow2.f32 %v2269_v34  ;;  %v2270_v60 = vmul.f32 -1.442695, %v1803_v40  ;;  %v2448_v44 = vpop.f32.mrb[23].mxu1  ;;  %v2460_v37 = vpop.f32.mrb[31].mxu0 }
 0x9eb   : > { %2757 = vpow2.f32 %v2270_v60 }
 0x9f3   : > { %v2756_v46 = vpop.eup %2755 }
 0x9f4   : > { %v1886_v48 = vadd.f32 1.0, %v2756_v46 }
 0x9f5   : > { %v2758_v49 = vpop.eup %2757 }
 0x9f6   : > { %2759 = vrcp.f32 %v1886_v48  ;;  %v1887_v7 = vadd.f32 1.0, %v2758_v49 }
 0x9f8   : > { %2761 = vrcp.f32 %v1887_v7 }
 0xa00   : > { %v2760_v33 = vpop.eup %2759 }
 0xa01   : > { %v1892_v53 = vmul.f32 %v2760_v33, %v1800_v36 }
 0xa02   : > { %v2762_v50 = vpop.eup %2761 }
 0xa03   : > { %v1894_v59 = vmul.f32 %v1892_v53, %v1873_v38  ;;  %v1893_v61 = vmul.f32 %v2762_v50, %v1803_v40 }
 0xa05   : > { %v1895_v0 = vmul.f32 %v1893_v61, %v1876_v42 }
 0xa07   : > { %v1896_v63 = vpack.c.bf16 %v1895_v0, %v1894_v59 }
 0xa09   : > { %2478 = vmatmul.mubr.bf16.vlgmr.msra.gmra.mrb[24].mxu1 %v1896_v63 }
 0xadc   : > { %v1995_v1 = vpop.f32.mrb[24].mxu1 }
 0xadd   : > { %v2002_v3 = vadd.f32 %v1995_v1, %v4018_v6  ;;  %v2479_v5 = vpop.f32.mrb[25].mxu1 }
 0xade   : > { %v1998_v62 = vpop.f32.mrb[26].mxu1 }
 0xadf   : > { %2004 = vst.msk [vmem:[%s587_s20] sm:$0xff] %vm593_vm0, %v2002_v3  ;;  %v2003_v47 = vadd.f32 %v1998_v62, %v4021_v11  ;;  %v2480_v8 = vpop.f32.mrb[27].mxu1 }
 0xae1   : > { %2005 = vst.msk [vmem:[%s587_s20 + $0x8] sm:$0xff] %vm593_vm0, %v2003_v47 }
 0xae2   : > { %3116 = shalt.err (!%p3113_p9)
}
 0xae3   : > { %s3117_s20 = scalar_lea.hbm %s4060_s0, 256  ;;  %s3121_s26 = scalar_lea.hbm %s4160_s3, 512 }
 0xae4   : > { %p3118_p7 = scmp.ne.s32.totalorder %s4060_s0, %s3117_s20  ;;  %p3122_p1 = scmp.lt.u32.totalorder %s4060_s0, %s4160_s3 }
 0xae5   : > { %p3123_p13 = scmp.lt.u32.totalorder %s3121_s26, %s3117_s20  ;;  %p3125_p2 = scmp.lt.u32.totalorder %s3117_s20, %s4060_s0 }
 0xae6   : > { %p3119_p10 = pnand %p3118_p7, %p4161_p8 }
 0xae7   : > { %p3124_p0 = por %p3123_p13, %p3122_p1 }
 0xae8   : > { %p3120_p4 = pneg %p3119_p10 }
 0xae9   : > { %p3126_p6 = por %p3125_p2, %p3124_p0 }
 0xaeb   : > { %p3127_p11 = pnand %p3126_p6, %p3120_p4 }
 0xaed   : > { %3130 = shalt.err (!%p3127_p11)
}
 0xaee   : > { %s3222_s19 = smov 128   ;;  %s4162_s16 = smov 8  }
 0xaef   : > { %2527 = dma.vmem_to_hbm [thread:$0]  (%p4161_p8), %s4053_s13, 256, %s4060_s0, %s2007_s27, %s3222_s19, %s3222_s19, %s4162_s16  }
 0xaf0 PF: > { %s2035_s28 = sand.u32 1, %s3181_s21   ;;  %p4163_p12 = scmp.ne.s32.totalorder %s4141_s30, 0 }
 0xaf1   : > { %p4164_p3 = scmp.ge.s32.totalorder %s3193_s24, 2  ;;  %s2036_s20 = scalar_lea.sflag [#allocation4], %s2035_s28 }
 0xaf3   : > { %p2568_p5 = pnand %p4164_p3, %p4163_p12 }
 0xaf5   : > { %3176 = dma.done.wait (!%p2568_p5), %s2036_s20, 256  }
 0xaf6   : > { %3178 = vsyncadd (!%p2568_p5), %s2036_s20, 4294967040  ;;  %p31_p9 = scmp.ge.s32.totalorder %s3582_s25, 4   ;;  %s4165_s21 = smov %s3185_s22 }
 0xaf7   : > { %s4166_s22 = smov %s3189_s23  ;;  %s4167_s23 = smov %s3594_s29 }
 0xaf8   : > { %s4168_s24 = smov %s3582_s25  ;;  %33 = sbr.rel (!%p31_p9) target bundleno = 16 (0x10), region = 157 }
 0xaff   :  { %2041 = vsyncpa [#allocation3], 1 }
 0xb00   :  { %2043 = vsyncpa [#allocation3 + $0x1], 1 }
 0xb01   :  { %2044 = vsyncpa [#allocation6], 1 }
 0xb02   :  { %2045 = vsyncpa [#allocation9], 1 }
 0xb03   :  { %2046 = vsyncpa [#allocation12], 1 }
 0xb04   :  { %2047 = vsyncpa [#allocation15], 1 }
 0xb05   :  { %2048 = vsyncpa [#allocation18], 1 }
 0xb06   :  { %2049 = vsyncpa [#allocation21], 1 }
 0xb07   :  { %2050 = vsyncpa [#allocation4], 1 }
 0xb08   :  { %2052 = vsyncpa [#allocation4 + $0x1], 1 }

</bundles_post_ra>
